<compile_context>
chip_gen: v5e
topology: v5e:2x2
jax: 0.10.0
libtpu: 0.0.40
codegen_flags: <defaults>
</compile_context>

<pallas_src>
import functools

import numpy as np
import jax
import jax.numpy as jnp
from jax.experimental import pallas as pl
from jax.experimental.pallas import tpu as pltpu


def _round_up(a: int, b: int) -> int:
    return (a + b - 1) // b * b


def _seg_argmax_one_hot(score, k):
    """Segmented (width-k lane blocks) argmax -> f32 one-hot.

    score: (rows, n_lanes) f32 with n_lanes % k == 0.  Returns a one-hot with a
    single 1 per length-k lane segment at the FIRST occurrence of the segment
    maximum (matches argmin tie-breaking of the distance formulation).
    Implemented as suffix+prefix scans: 4*ceil(log2 k) pltpu.roll steps (XLU)
    plus VPU selects — overlaps the MXU matmuls, no lane slicing/concatenation.
    """
    n_lanes = score.shape[-1]
    axis = score.ndim - 1
    pos = jax.lax.broadcasted_iota(jnp.int32, score.shape, axis) % k  # hoisted once

    def combine(v, i, ov, oi):
        take = (ov > v) | ((ov == v) & (oi < i))
        return jnp.where(take, ov, v), jnp.where(take, oi, i)

    sv, si = score, pos          # suffix scan: argmax over [p, k)
    pv, pi = score, pos          # prefix scan: argmax over [0, p]
    d = 1
    while d < k:
        # suffix step: combine with element at p + d (same segment only)
        ov = pltpu.roll(sv, shift=n_lanes - d, axis=axis)   # ov[p] = sv[p + d]
        oi = pltpu.roll(si, shift=n_lanes - d, axis=axis)
        ok = (pos + d) < k
        nv, ni = combine(sv, si, ov, oi)
        sv = jnp.where(ok, nv, sv)
        si = jnp.where(ok, ni, si)
        # prefix step: combine with element at p - d (same segment only)
        ov = pltpu.roll(pv, shift=d, axis=axis)              # ov[p] = pv[p - d]
        oi = pltpu.roll(pi, shift=d, axis=axis)
        ok = pos >= d
        nv, ni = combine(pv, pi, ov, oi)
        pv = jnp.where(ok, nv, pv)
        pi = jnp.where(ok, ni, pi)
        d *= 2
    _, wi = combine(sv, si, pv, pi)   # full-segment argmax index at every lane
    return (pos == wi).astype(jnp.float32)


def _pq_linear_kernel(x_ref, centbd_ref, halfc2_ref, lut_ref, bias_ref,
                      out_ref, onehot_ref, *, k, score_dtype):
    # The codebook assignment depends only on the token tile (grid axis 0):
    # compute it once per token tile (first O tile) and cache it in VMEM scratch
    # so the remaining output-feature tiles only pay the LUT matmul.
    @pl.when(pl.program_id(1) == 0)
    def _():
        x = x_ref[...].astype(score_dtype)
        # score[n, c*K+j] = x_nc . cent_cj - 0.5*||cent_cj||^2 ; argmax == argmin dist.
        score = jnp.dot(x, centbd_ref[...],
                        preferred_element_type=jnp.float32) - halfc2_ref[...]
        onehot_ref[...] = _seg_argmax_one_hot(score, k).astype(onehot_ref.dtype)

    # Gather-and-sum over codebooks as one lane-dense matmul against the LUT tile.
    out = jnp.dot(onehot_ref[...], lut_ref[...],
                  preferred_element_type=jnp.float32)
    out_ref[...] = (out + bias_ref[...]).astype(out_ref.dtype)


@functools.partial(jax.jit, static_argnames=(
    "tile_n", "tile_o", "score_dtype", "lut_dtype", "single_buffer_invariants"))
def pq_linear_forward(x, centroids, weight, inv_temp_logit, bias, *,
                      tile_n=512, tile_o=512,
                      score_dtype=jnp.float32, lut_dtype=jnp.float32,
                      single_buffer_invariants=True):
    # inverse_temperature_logit only affects the straight-through gradient path;
    # the forward value does not depend on it.
    del inv_temp_logit
    lead = x.shape[:-1]
    C, K, S = centroids.shape
    F = C * S
    O = weight.shape[-1]
    N = int(np.prod(lead)) if lead else 1

    cent = centroids.astype(jnp.float32)
    w = weight.astype(jnp.float32)

    # ---- one-time, parameter-sized XLA preprocessing -------------------------
    # Lane axis C*K is padded so it is (a) a multiple of 128 (lane-dense matmuls
    # and rolls) and (b) still a multiple of K (padding adds whole fake codebooks
    # whose LUT rows are zero -> zero contribution).
    CK = C * K
    CK_pad = _round_up(CK, int(np.lcm(K, 128)))
    O_pad = _round_up(O, 128)                     # lane-dense output stores

    # Block-diagonal centroid matrix (F, CK_pad): column block c holds centroids[c].T.
    eye_c = jnp.eye(C, dtype=jnp.float32)
    cent_bd = (jnp.transpose(cent, (0, 2, 1))[:, :, None, :]
               * eye_c[:, None, :, None]).reshape(F, CK)
    cent_bd = jnp.pad(cent_bd, ((0, 0), (0, CK_pad - CK))).astype(score_dtype)
    half_c2 = jnp.pad((0.5 * jnp.sum(cent * cent, axis=-1)).reshape(1, CK),
                      ((0, 0), (0, CK_pad - CK)))                 # stays f32

    # lut[c*K+j, :] = centroids[c, j] @ weight[c]; padded rows/cols are zero.
    lut = jnp.einsum('cks,cso->cko', cent, w).reshape(CK, O)
    lut = jnp.pad(lut, ((0, CK_pad - CK), (0, O_pad - O))).astype(lut_dtype)

    if bias is None:
        bias_arr = jnp.zeros((1, O_pad), jnp.float32)
    else:
        bias_arr = jnp.pad(bias.astype(jnp.float32).reshape(1, O),
                           ((0, 0), (0, O_pad - O)))

    # ---- x streaming: native dtype, leading-dim collapse only (no HBM pass) --
    xf = x.reshape(N, F)
    tn = min(tile_n, _round_up(N, 8))
    N_pad = _round_up(N, tn)
    if N_pad != N:                                 # pad only when N % tn != 0
        xf = jnp.pad(xf, ((0, N_pad - N), (0, 0)))

    # Output-feature tile: multiple of 128 that divides O_pad.
    to = max(128, min(_round_up(tile_o, 128), O_pad))
    while O_pad % to != 0:
        to -= 128

    grid = (N_pad // tn, O_pad // to)

    def inv_spec(shape):
        # Grid-invariant operands: fetched once; single-buffer them to save VMEM.
        if single_buffer_invariants:
            return pl.BlockSpec(shape, lambda n, o: (0, 0),
                                pipeline_mode=pl.Buffered(1))
        return pl.BlockSpec(shape, lambda n, o: (0, 0))

    kernel = functools.partial(_pq_linear_kernel, k=K, score_dtype=score_dtype)
    out = pl.pallas_call(
        kernel,
        out_shape=jax.ShapeDtypeStruct((N_pad, O_pad), jnp.float32),
        grid_spec=pltpu.PrefetchScalarGridSpec(
            num_scalar_prefetch=0,
            grid=grid,
            in_specs=[
                pl.BlockSpec((tn, F), lambda n, o: (n, 0)),       # x tile (native dtype)
                inv_spec((F, CK_pad)),                            # block-diag centroids
                inv_spec((1, CK_pad)),                            # 0.5*||cent||^2
                pl.BlockSpec((CK_pad, to), lambda n, o: (0, o)),  # LUT tile
                pl.BlockSpec((1, to), lambda n, o: (0, o)),       # bias tile
            ],
            out_specs=pl.BlockSpec((tn, to), lambda n, o: (n, o)),
            scratch_shapes=[pltpu.VMEM((tn, CK_pad), lut_dtype)],  # cached one-hot
        ),
        compiler_params=pltpu.CompilerParams(
            dimension_semantics=("parallel", "arbitrary")),
    )(xf, cent_bd, half_c2, lut, bias_arr)

    if N_pad != N or O_pad != O:
        out = out[:N, :O]
    return out.reshape(*lead, O)


def _reference(x, centroids, weight, inv_temp_logit, bias):
    """Pure-JAX reference mirroring the torch forward (incl. STE arithmetic)."""
    lead = x.shape[:-1]
    C, K, S = centroids.shape
    O = weight.shape[-1]
    N = int(np.prod(lead))
    xr = jnp.transpose(x.reshape(N, C, S), (1, 0, 2))                 # (C,N,S)
    diff = xr[:, :, None, :] - centroids[:, None, :, :]               # (C,N,K,S)
    dist = jnp.sqrt(jnp.sum(diff * diff, axis=-1))                    # (C,N,K)
    scale = jax.nn.softplus(inv_temp_logit)[0] + 1.0
    attn = jax.nn.softmax(-dist * scale, axis=-1)
    lut = jnp.einsum('cks,cso->cko', centroids, weight)               # (C,K,O)
    training = jnp.einsum('cnk,cko->no', attn, lut)
    one_hot = jax.nn.one_hot(jnp.argmin(dist, axis=-1), K, dtype=jnp.float32)
    inference = jnp.einsum('cnk,cko->no', one_hot, lut)
    out = training - (training - inference)
    if bias is not None:
        out = out + bias
    return out.reshape(*lead, O)


if __name__ == "__main__":
    # small config consistent with the module
    batch, seq = 2, 8
    ncodebooks, in_features, out_features, k = 4, 32, 32, 16
    subvec_len = in_features // ncodebooks

    key = jax.random.PRNGKey(0)
    k1, k2, k3, k4, k5 = jax.random.split(key, 5)
    centroids = jax.random.normal(k1, (ncodebooks, k, subvec_len), jnp.float32)
    weight = jax.random.normal(k2, (ncodebooks, subvec_len, out_features), jnp.float32)
    inv_temp_logit = jax.random.normal(k3, (1,), jnp.float32)
    bias = jax.random.normal(k4, (out_features,), jnp.float32)
    x = jax.random.normal(k5, (batch, seq, in_features), jnp.float32)

    # Exact (f32) path: forward value must match the torch-equivalent reference.
    try:
        out = pq_linear_forward(x, centroids, weight, inv_temp_logit, bias)
    except Exception:
        # Fallback for jax versions without BlockSpec(pipeline_mode=...).
        out = pq_linear_forward(x, centroids, weight, inv_temp_logit, bias,
                                single_buffer_invariants=False)
    out = jax.block_until_ready(out)

    ref = _reference(x, centroids, weight, inv_temp_logit, bias)
    np.testing.assert_allclose(np.asarray(out), np.asarray(ref), rtol=1e-4, atol=1e-4)

    # bf16 fast path (per perf review): exercised for compile/run coverage only —
    # near-tie assignments and bf16 LUT rounding may legally differ from the f32
    # argmin reference, so only shape/finiteness is checked.
    try:
        out_bf16 = pq_linear_forward(
            x, centroids, weight, inv_temp_logit, bias,
            score_dtype=jnp.bfloat16, lut_dtype=jnp.bfloat16)
    except Exception:
        out_bf16 = pq_linear_forward(
            x, centroids, weight, inv_temp_logit, bias,
            score_dtype=jnp.bfloat16, lut_dtype=jnp.bfloat16,
            single_buffer_invariants=False)
    out_bf16 = jax.block_until_ready(out_bf16)
    assert out_bf16.shape == ref.shape and bool(jnp.all(jnp.isfinite(out_bf16)))

    print("KERNEL_OK")
</pallas_src>

<mosaic_0001>
module attributes {stable_mosaic.version = 11 : i64} {
  func.func @_pq_linear_kernel(%arg0: i32, %arg1: i32, %arg2: memref<16x32xf32, #tpu.memory_space<vmem>>, %arg3: memref<32x128xf32, #tpu.memory_space<vmem>>, %arg4: memref<1x128xf32, #tpu.memory_space<vmem>>, %arg5: memref<128x128xf32, #tpu.memory_space<vmem>>, %arg6: memref<1x128xf32, #tpu.memory_space<vmem>>, %arg7: memref<16x128xf32, #tpu.memory_space<vmem>>, %arg8: memref<16x128xf32, #tpu.memory_space<vmem>>) attributes {dimension_semantics = [#tpu.dimension_semantics<parallel>, #tpu.dimension_semantics<arbitrary>], iteration_bounds = array<i64: 1, 1>, scalar_prefetch = 0 : i64, scratch_operands = 1 : i64, tpu.core_type = #tpu.core_type<tc>, window_params = [{transform_indices = @transform_0, window_bounds = array<i64: 16, 32>}, {pipeline_mode = #tpu.pipeline_mode<synchronous>, transform_indices = @transform_1, window_bounds = array<i64: 32, 128>}, {pipeline_mode = #tpu.pipeline_mode<synchronous>, transform_indices = @transform_2, window_bounds = array<i64: 1, 128>}, {transform_indices = @transform_3, window_bounds = array<i64: 128, 128>}, {transform_indices = @transform_4, window_bounds = array<i64: 1, 128>}, {transform_indices = @transform_5, window_bounds = array<i64: 16, 128>}]} {
    %c0_i32 = arith.constant 0 : i32
    %0 = arith.cmpi eq, %arg1, %c0_i32 : i32
    %1 = arith.extui %0 : i1 to i32
    %c0_i32_0 = arith.constant 0 : i32
    %2 = arith.cmpi ne, %1, %c0_i32_0 : i32
    scf.if %2 {
      %c0_8 = arith.constant 0 : index
      %c0_9 = arith.constant 0 : index
      %10 = vector.load %arg2[%c0_8, %c0_9] : memref<16x32xf32, #tpu.memory_space<vmem>>, vector<16x32xf32>
      %c0_10 = arith.constant 0 : index
      %c0_11 = arith.constant 0 : index
      %11 = vector.load %arg3[%c0_10, %c0_11] : memref<32x128xf32, #tpu.memory_space<vmem>>, vector<32x128xf32>
      %cst_12 = arith.constant dense<0.000000e+00> : vector<16x128xf32>
      %12 = tpu.matmul %10, %11, %cst_12 {dimension_numbers = #tpu.dot_dimension_numbers<[1], [0], [0], [1], [0, 0, 1, 1], [], []>} : vector<16x32xf32>, vector<32x128xf32>, vector<16x128xf32> -> vector<16x128xf32>
      %c0_13 = arith.constant 0 : index
      %c0_14 = arith.constant 0 : index
      %13 = vector.load %arg4[%c0_13, %c0_14] : memref<1x128xf32, #tpu.memory_space<vmem>>, vector<1x128xf32>
      %14 = vector.broadcast %13 : vector<1x128xf32> to vector<16x128xf32>
      %15 = arith.subf %12, %14 : vector<16x128xf32>
      %16 = tpu.iota {dimensions = array<i32: 1>} : vector<16x128xi32>
      %c16_i32 = arith.constant 16 : i32
      %c0_i32_15 = arith.constant 0 : i32
      %17 = arith.cmpi eq, %c16_i32, %c0_i32_15 : i32
      %c1_i32 = arith.constant 1 : i32
      %18 = arith.select %17, %c1_i32, %c16_i32 : i32
      %19 = vector.broadcast %18 : i32 to vector<16x128xi32>
      %20 = arith.remsi %16, %19 : vector<16x128xi32>
      %c0_i32_16 = arith.constant 0 : i32
      %21 = vector.broadcast %c0_i32_16 : i32 to vector<16x128xi32>
      %22 = arith.cmpi ne, %20, %21 : vector<16x128xi32>
      %c0_i32_17 = arith.constant 0 : i32
      %23 = vector.broadcast %c0_i32_17 : i32 to vector<16x128xi32>
      %24 = arith.cmpi slt, %20, %23 : vector<16x128xi32>
      %c0_i32_18 = arith.constant 0 : i32
      %25 = arith.cmpi slt, %18, %c0_i32_18 : i32
      %26 = vector.broadcast %25 : i1 to vector<16x128xi1>
      %27 = vector.broadcast %26 : vector<16x128xi1> to vector<16x128xi1>
      %28 = arith.xori %24, %27 : vector<16x128xi1>
      %29 = arith.andi %28, %22 : vector<16x128xi1>
      %30 = vector.broadcast %18 : i32 to vector<16x128xi32>
      %31 = arith.addi %20, %30 : vector<16x128xi32>
      %32 = arith.select %29, %31, %20 : vector<16x128xi1>, vector<16x128xi32>
      %c127_i32 = arith.constant 127 : i32
      %33 = tpu.dynamic_rotate %15 by %c127_i32 dim 1 : vector<16x128xf32>, i32 -> vector<16x128xf32>
      %c127_i32_19 = arith.constant 127 : i32
      %34 = tpu.dynamic_rotate %32 by %c127_i32_19 dim 1 : vector<16x128xi32>, i32 -> vector<16x128xi32>
      %c1_i32_20 = arith.constant 1 : i32
      %35 = vector.broadcast %c1_i32_20 : i32 to vector<16x128xi32>
      %36 = arith.addi %32, %35 : vector<16x128xi32>
      %c16_i32_21 = arith.constant 16 : i32
      %37 = vector.broadcast %c16_i32_21 : i32 to vector<16x128xi32>
      %38 = arith.cmpi slt, %36, %37 : vector<16x128xi32>
      %39 = arith.cmpf ogt, %33, %15 : vector<16x128xf32>
      %40 = arith.cmpf oeq, %33, %15 : vector<16x128xf32>
      %41 = arith.cmpi slt, %34, %32 : vector<16x128xi32>
      %42 = arith.andi %40, %41 : vector<16x128xi1>
      %43 = arith.ori %39, %42 : vector<16x128xi1>
      %44 = arith.select %43, %33, %15 : vector<16x128xi1>, vector<16x128xf32>
      %45 = arith.select %43, %34, %32 : vector<16x128xi1>, vector<16x128xi32>
      %46 = arith.select %38, %44, %15 : vector<16x128xi1>, vector<16x128xf32>
      %47 = arith.select %38, %45, %32 : vector<16x128xi1>, vector<16x128xi32>
      %c1_i32_22 = arith.constant 1 : i32
      %48 = tpu.dynamic_rotate %15 by %c1_i32_22 dim 1 : vector<16x128xf32>, i32 -> vector<16x128xf32>
      %c1_i32_23 = arith.constant 1 : i32
      %49 = tpu.dynamic_rotate %32 by %c1_i32_23 dim 1 : vector<16x128xi32>, i32 -> vector<16x128xi32>
      %c1_i32_24 = arith.constant 1 : i32
      %50 = vector.broadcast %c1_i32_24 : i32 to vector<16x128xi32>
      %51 = arith.cmpi sge, %32, %50 : vector<16x128xi32>
      %52 = arith.cmpf ogt, %48, %15 : vector<16x128xf32>
      %53 = arith.cmpf oeq, %48, %15 : vector<16x128xf32>
      %54 = arith.cmpi slt, %49, %32 : vector<16x128xi32>
      %55 = arith.andi %53, %54 : vector<16x128xi1>
      %56 = arith.ori %52, %55 : vector<16x128xi1>
      %57 = arith.select %56, %48, %15 : vector<16x128xi1>, vector<16x128xf32>
      %58 = arith.select %56, %49, %32 : vector<16x128xi1>, vector<16x128xi32>
      %59 = arith.select %51, %57, %15 : vector<16x128xi1>, vector<16x128xf32>
      %60 = arith.select %51, %58, %32 : vector<16x128xi1>, vector<16x128xi32>
      %c126_i32 = arith.constant 126 : i32
      %61 = tpu.dynamic_rotate %46 by %c126_i32 dim 1 : vector<16x128xf32>, i32 -> vector<16x128xf32>
      %c126_i32_25 = arith.constant 126 : i32
      %62 = tpu.dynamic_rotate %47 by %c126_i32_25 dim 1 : vector<16x128xi32>, i32 -> vector<16x128xi32>
      %c2_i32 = arith.constant 2 : i32
      %63 = vector.broadcast %c2_i32 : i32 to vector<16x128xi32>
      %64 = arith.addi %32, %63 : vector<16x128xi32>
      %c16_i32_26 = arith.constant 16 : i32
      %65 = vector.broadcast %c16_i32_26 : i32 to vector<16x128xi32>
      %66 = arith.cmpi slt, %64, %65 : vector<16x128xi32>
      %67 = arith.cmpf ogt, %61, %46 : vector<16x128xf32>
      %68 = arith.cmpf oeq, %61, %46 : vector<16x128xf32>
      %69 = arith.cmpi slt, %62, %47 : vector<16x128xi32>
      %70 = arith.andi %68, %69 : vector<16x128xi1>
      %71 = arith.ori %67, %70 : vector<16x128xi1>
      %72 = arith.select %71, %61, %46 : vector<16x128xi1>, vector<16x128xf32>
      %73 = arith.select %71, %62, %47 : vector<16x128xi1>, vector<16x128xi32>
      %74 = arith.select %66, %72, %46 : vector<16x128xi1>, vector<16x128xf32>
      %75 = arith.select %66, %73, %47 : vector<16x128xi1>, vector<16x128xi32>
      %c2_i32_27 = arith.constant 2 : i32
      %76 = tpu.dynamic_rotate %59 by %c2_i32_27 dim 1 : vector<16x128xf32>, i32 -> vector<16x128xf32>
      %c2_i32_28 = arith.constant 2 : i32
      %77 = tpu.dynamic_rotate %60 by %c2_i32_28 dim 1 : vector<16x128xi32>, i32 -> vector<16x128xi32>
      %c2_i32_29 = arith.constant 2 : i32
      %78 = vector.broadcast %c2_i32_29 : i32 to vector<16x128xi32>
      %79 = arith.cmpi sge, %32, %78 : vector<16x128xi32>
      %80 = arith.cmpf ogt, %76, %59 : vector<16x128xf32>
      %81 = arith.cmpf oeq, %76, %59 : vector<16x128xf32>
      %82 = arith.cmpi slt, %77, %60 : vector<16x128xi32>
      %83 = arith.andi %81, %82 : vector<16x128xi1>
      %84 = arith.ori %80, %83 : vector<16x128xi1>
      %85 = arith.select %84, %76, %59 : vector<16x128xi1>, vector<16x128xf32>
      %86 = arith.select %84, %77, %60 : vector<16x128xi1>, vector<16x128xi32>
      %87 = arith.select %79, %85, %59 : vector<16x128xi1>, vector<16x128xf32>
      %88 = arith.select %79, %86, %60 : vector<16x128xi1>, vector<16x128xi32>
      %c124_i32 = arith.constant 124 : i32
      %89 = tpu.dynamic_rotate %74 by %c124_i32 dim 1 : vector<16x128xf32>, i32 -> vector<16x128xf32>
      %c124_i32_30 = arith.constant 124 : i32
      %90 = tpu.dynamic_rotate %75 by %c124_i32_30 dim 1 : vector<16x128xi32>, i32 -> vector<16x128xi32>
      %c4_i32 = arith.constant 4 : i32
      %91 = vector.broadcast %c4_i32 : i32 to vector<16x128xi32>
      %92 = arith.addi %32, %91 : vector<16x128xi32>
      %c16_i32_31 = arith.constant 16 : i32
      %93 = vector.broadcast %c16_i32_31 : i32 to vector<16x128xi32>
      %94 = arith.cmpi slt, %92, %93 : vector<16x128xi32>
      %95 = arith.cmpf ogt, %89, %74 : vector<16x128xf32>
      %96 = arith.cmpf oeq, %89, %74 : vector<16x128xf32>
      %97 = arith.cmpi slt, %90, %75 : vector<16x128xi32>
      %98 = arith.andi %96, %97 : vector<16x128xi1>
      %99 = arith.ori %95, %98 : vector<16x128xi1>
      %100 = arith.select %99, %89, %74 : vector<16x128xi1>, vector<16x128xf32>
      %101 = arith.select %99, %90, %75 : vector<16x128xi1>, vector<16x128xi32>
      %102 = arith.select %94, %100, %74 : vector<16x128xi1>, vector<16x128xf32>
      %103 = arith.select %94, %101, %75 : vector<16x128xi1>, vector<16x128xi32>
      %c4_i32_32 = arith.constant 4 : i32
      %104 = tpu.dynamic_rotate %87 by %c4_i32_32 dim 1 : vector<16x128xf32>, i32 -> vector<16x128xf32>
      %c4_i32_33 = arith.constant 4 : i32
      %105 = tpu.dynamic_rotate %88 by %c4_i32_33 dim 1 : vector<16x128xi32>, i32 -> vector<16x128xi32>
      %c4_i32_34 = arith.constant 4 : i32
      %106 = vector.broadcast %c4_i32_34 : i32 to vector<16x128xi32>
      %107 = arith.cmpi sge, %32, %106 : vector<16x128xi32>
      %108 = arith.cmpf ogt, %104, %87 : vector<16x128xf32>
      %109 = arith.cmpf oeq, %104, %87 : vector<16x128xf32>
      %110 = arith.cmpi slt, %105, %88 : vector<16x128xi32>
      %111 = arith.andi %109, %110 : vector<16x128xi1>
      %112 = arith.ori %108, %111 : vector<16x128xi1>
      %113 = arith.select %112, %104, %87 : vector<16x128xi1>, vector<16x128xf32>
      %114 = arith.select %112, %105, %88 : vector<16x128xi1>, vector<16x128xi32>
      %115 = arith.select %107, %113, %87 : vector<16x128xi1>, vector<16x128xf32>
      %116 = arith.select %107, %114, %88 : vector<16x128xi1>, vector<16x128xi32>
      %c120_i32 = arith.constant 120 : i32
      %117 = tpu.dynamic_rotate %102 by %c120_i32 dim 1 : vector<16x128xf32>, i32 -> vector<16x128xf32>
      %c120_i32_35 = arith.constant 120 : i32
      %118 = tpu.dynamic_rotate %103 by %c120_i32_35 dim 1 : vector<16x128xi32>, i32 -> vector<16x128xi32>
      %c8_i32 = arith.constant 8 : i32
      %119 = vector.broadcast %c8_i32 : i32 to vector<16x128xi32>
      %120 = arith.addi %32, %119 : vector<16x128xi32>
      %c16_i32_36 = arith.constant 16 : i32
      %121 = vector.broadcast %c16_i32_36 : i32 to vector<16x128xi32>
      %122 = arith.cmpi slt, %120, %121 : vector<16x128xi32>
      %123 = arith.cmpf ogt, %117, %102 : vector<16x128xf32>
      %124 = arith.cmpf oeq, %117, %102 : vector<16x128xf32>
      %125 = arith.cmpi slt, %118, %103 : vector<16x128xi32>
      %126 = arith.andi %124, %125 : vector<16x128xi1>
      %127 = arith.ori %123, %126 : vector<16x128xi1>
      %128 = arith.select %127, %117, %102 : vector<16x128xi1>, vector<16x128xf32>
      %129 = arith.select %127, %118, %103 : vector<16x128xi1>, vector<16x128xi32>
      %130 = arith.select %122, %128, %102 : vector<16x128xi1>, vector<16x128xf32>
      %131 = arith.select %122, %129, %103 : vector<16x128xi1>, vector<16x128xi32>
      %c8_i32_37 = arith.constant 8 : i32
      %132 = tpu.dynamic_rotate %115 by %c8_i32_37 dim 1 : vector<16x128xf32>, i32 -> vector<16x128xf32>
      %c8_i32_38 = arith.constant 8 : i32
      %133 = tpu.dynamic_rotate %116 by %c8_i32_38 dim 1 : vector<16x128xi32>, i32 -> vector<16x128xi32>
      %c8_i32_39 = arith.constant 8 : i32
      %134 = vector.broadcast %c8_i32_39 : i32 to vector<16x128xi32>
      %135 = arith.cmpi sge, %32, %134 : vector<16x128xi32>
      %136 = arith.cmpf ogt, %132, %115 : vector<16x128xf32>
      %137 = arith.cmpf oeq, %132, %115 : vector<16x128xf32>
      %138 = arith.cmpi slt, %133, %116 : vector<16x128xi32>
      %139 = arith.andi %137, %138 : vector<16x128xi1>
      %140 = arith.ori %136, %139 : vector<16x128xi1>
      %141 = arith.select %140, %132, %115 : vector<16x128xi1>, vector<16x128xf32>
      %142 = arith.select %140, %133, %116 : vector<16x128xi1>, vector<16x128xi32>
      %143 = arith.select %135, %141, %115 : vector<16x128xi1>, vector<16x128xf32>
      %144 = arith.select %135, %142, %116 : vector<16x128xi1>, vector<16x128xi32>
      %145 = arith.cmpf ogt, %143, %130 : vector<16x128xf32>
      %146 = arith.cmpf oeq, %143, %130 : vector<16x128xf32>
      %147 = arith.cmpi slt, %144, %131 : vector<16x128xi32>
      %148 = arith.andi %146, %147 : vector<16x128xi1>
      %149 = arith.ori %145, %148 : vector<16x128xi1>
      %150 = arith.select %149, %144, %131 : vector<16x128xi1>, vector<16x128xi32>
      %151 = arith.cmpi eq, %32, %150 : vector<16x128xi32>
      %152 = arith.extui %151 : vector<16x128xi1> to vector<16x128xi32>
      %153 = arith.sitofp %152 : vector<16x128xi32> to vector<16x128xf32>
      %c0_40 = arith.constant 0 : index
      %c0_41 = arith.constant 0 : index
      %154 = vector.load %arg8[%c0_40, %c0_41] : memref<16x128xf32, #tpu.memory_space<vmem>>, vector<16x128xf32>
      tpu.vector_store %arg8[%c0_40, %c0_41], %153 {strides = array<i32>} : memref<16x128xf32, #tpu.memory_space<vmem>>, vector<16x128xf32>,
    } else {
    }
    %c0 = arith.constant 0 : index
    %c0_1 = arith.constant 0 : index
    %3 = vector.load %arg8[%c0, %c0_1] : memref<16x128xf32, #tpu.memory_space<vmem>>, vector<16x128xf32>
    %c0_2 = arith.constant 0 : index
    %c0_3 = arith.constant 0 : index
    %4 = vector.load %arg5[%c0_2, %c0_3] : memref<128x128xf32, #tpu.memory_space<vmem>>, vector<128x128xf32>
    %cst = arith.constant dense<0.000000e+00> : vector<16x128xf32>
    %5 = tpu.matmul %3, %4, %cst {dimension_numbers = #tpu.dot_dimension_numbers<[1], [0], [0], [1], [0, 0, 1, 1], [], []>} : vector<16x128xf32>, vector<128x128xf32>, vector<16x128xf32> -> vector<16x128xf32>
    %c0_4 = arith.constant 0 : index
    %c0_5 = arith.constant 0 : index
    %6 = vector.load %arg6[%c0_4, %c0_5] : memref<1x128xf32, #tpu.memory_space<vmem>>, vector<1x128xf32>
    %7 = vector.broadcast %6 : vector<1x128xf32> to vector<16x128xf32>
    %8 = arith.addf %5, %7 : vector<16x128xf32>
    %c0_6 = arith.constant 0 : index
    %c0_7 = arith.constant 0 : index
    %9 = vector.load %arg7[%c0_6, %c0_7] : memref<16x128xf32, #tpu.memory_space<vmem>>, vector<16x128xf32>
    tpu.vector_store %arg7[%c0_6, %c0_7], %8 {strides = array<i32>} : memref<16x128xf32, #tpu.memory_space<vmem>>, vector<16x128xf32>,
    return
  }
  func.func @transform_0(%arg0: i32, %arg1: i32) -> (i32, i32) {
    %c0_i32 = arith.constant 0 : i32
    %c0_i32_0 = arith.constant 0 : i32
    return %arg0, %c0_i32 : i32, i32
  }
  func.func @transform_1(%arg0: i32, %arg1: i32) -> (i32, i32) {
    %c0_i32 = arith.constant 0 : i32
    %c0_i32_0 = arith.constant 0 : i32
    %c0_i32_1 = arith.constant 0 : i32
    return %c0_i32, %c0_i32_0 : i32, i32
  }
  func.func @transform_2(%arg0: i32, %arg1: i32) -> (i32, i32) {
    %c0_i32 = arith.constant 0 : i32
    %c0_i32_0 = arith.constant 0 : i32
    %c0_i32_1 = arith.constant 0 : i32
    return %c0_i32, %c0_i32_0 : i32, i32
  }
  func.func @transform_3(%arg0: i32, %arg1: i32) -> (i32, i32) {
    %c0_i32 = arith.constant 0 : i32
    %c0_i32_0 = arith.constant 0 : i32
    return %c0_i32, %arg1 : i32, i32
  }
  func.func @transform_4(%arg0: i32, %arg1: i32) -> (i32, i32) {
    %c0_i32 = arith.constant 0 : i32
    %c0_i32_0 = arith.constant 0 : i32
    return %c0_i32, %arg1 : i32, i32
  }
  func.func @transform_5(%arg0: i32, %arg1: i32) -> (i32, i32) {
    %c0_i32 = arith.constant 0 : i32
    return %arg0, %arg1 : i32, i32
  }
}

module attributes {stable_mosaic.version = 11 : i64} {
  func.func @_pq_linear_kernel(%arg0: i32, %arg1: i32, %arg2: memref<16x32xf32, #tpu.memory_space<vmem>>, %arg3: memref<32x128xf32, #tpu.memory_space<vmem>>, %arg4: memref<1x128xf32, #tpu.memory_space<vmem>>, %arg5: memref<128x128xf32, #tpu.memory_space<vmem>>, %arg6: memref<1x128xf32, #tpu.memory_space<vmem>>, %arg7: memref<16x128xf32, #tpu.memory_space<vmem>>, %arg8: memref<16x128xf32, #tpu.memory_space<vmem>>) attributes {dimension_semantics = [#tpu.dimension_semantics<parallel>, #tpu.dimension_semantics<arbitrary>], iteration_bounds = array<i64: 1, 1>, scalar_prefetch = 0 : i64, scratch_operands = 1 : i64, tpu.core_type = #tpu.core_type<tc>, window_params = [{transform_indices = @transform_0, window_bounds = array<i64: 16, 32>}, {pipeline_mode = #tpu.pipeline_mode<synchronous>, transform_indices = @transform_1, window_bounds = array<i64: 32, 128>}, {pipeline_mode = #tpu.pipeline_mode<synchronous>, transform_indices = @transform_2, window_bounds = array<i64: 1, 128>}, {transform_indices = @transform_3, window_bounds = array<i64: 128, 128>}, {transform_indices = @transform_4, window_bounds = array<i64: 1, 128>}, {transform_indices = @transform_5, window_bounds = array<i64: 16, 128>}]} {
    %c0_i32 = arith.constant 0 : i32
    %0 = arith.cmpi eq, %arg1, %c0_i32 : i32
    %1 = arith.extui %0 : i1 to i32
    %c0_i32_0 = arith.constant 0 : i32
    %2 = arith.cmpi ne, %1, %c0_i32_0 : i32
    scf.if %2 {
      %c0_8 = arith.constant 0 : index
      %c0_9 = arith.constant 0 : index
      %10 = vector.load %arg2[%c0_8, %c0_9] : memref<16x32xf32, #tpu.memory_space<vmem>>, vector<16x32xf32>
      %c0_10 = arith.constant 0 : index
      %c0_11 = arith.constant 0 : index
      %11 = vector.load %arg3[%c0_10, %c0_11] : memref<32x128xf32, #tpu.memory_space<vmem>>, vector<32x128xf32>
      %cst_12 = arith.constant dense<0.000000e+00> : vector<16x128xf32>
      %12 = tpu.matmul %10, %11, %cst_12 {dimension_numbers = #tpu.dot_dimension_numbers<[1], [0], [0], [1], [0, 0, 1, 1], [], []>} : vector<16x32xf32>, vector<32x128xf32>, vector<16x128xf32> -> vector<16x128xf32>
      %c0_13 = arith.constant 0 : index
      %c0_14 = arith.constant 0 : index
      %13 = vector.load %arg4[%c0_13, %c0_14] : memref<1x128xf32, #tpu.memory_space<vmem>>, vector<1x128xf32>
      %14 = vector.broadcast %13 : vector<1x128xf32> to vector<16x128xf32>
      %15 = arith.subf %12, %14 : vector<16x128xf32>
      %16 = tpu.iota {dimensions = array<i32: 1>} : vector<16x128xi32>
      %c16_i32 = arith.constant 16 : i32
      %c0_i32_15 = arith.constant 0 : i32
      %17 = arith.cmpi eq, %c16_i32, %c0_i32_15 : i32
      %c1_i32 = arith.constant 1 : i32
      %18 = arith.select %17, %c1_i32, %c16_i32 : i32
      %19 = vector.broadcast %18 : i32 to vector<16x128xi32>
      %20 = arith.remsi %16, %19 : vector<16x128xi32>
      %c0_i32_16 = arith.constant 0 : i32
      %21 = vector.broadcast %c0_i32_16 : i32 to vector<16x128xi32>
      %22 = arith.cmpi ne, %20, %21 : vector<16x128xi32>
      %c0_i32_17 = arith.constant 0 : i32
      %23 = vector.broadcast %c0_i32_17 : i32 to vector<16x128xi32>
      %24 = arith.cmpi slt, %20, %23 : vector<16x128xi32>
      %c0_i32_18 = arith.constant 0 : i32
      %25 = arith.cmpi slt, %18, %c0_i32_18 : i32
      %26 = vector.broadcast %25 : i1 to vector<16x128xi1>
      %27 = vector.broadcast %26 : vector<16x128xi1> to vector<16x128xi1>
      %28 = arith.xori %24, %27 : vector<16x128xi1>
      %29 = arith.andi %28, %22 : vector<16x128xi1>
      %30 = vector.broadcast %18 : i32 to vector<16x128xi32>
      %31 = arith.addi %20, %30 : vector<16x128xi32>
      %32 = arith.select %29, %31, %20 : vector<16x128xi1>, vector<16x128xi32>
      %c127_i32 = arith.constant 127 : i32
      %33 = tpu.dynamic_rotate %15 by %c127_i32 dim 1 : vector<16x128xf32>, i32 -> vector<16x128xf32>
      %c127_i32_19 = arith.constant 127 : i32
      %34 = tpu.dynamic_rotate %32 by %c127_i32_19 dim 1 : vector<16x128xi32>, i32 -> vector<16x128xi32>
      %c1_i32_20 = arith.constant 1 : i32
      %35 = vector.broadcast %c1_i32_20 : i32 to vector<16x128xi32>
      %36 = arith.addi %32, %35 : vector<16x128xi32>
      %c16_i32_21 = arith.constant 16 : i32
      %37 = vector.broadcast %c16_i32_21 : i32 to vector<16x128xi32>
      %38 = arith.cmpi slt, %36, %37 : vector<16x128xi32>
      %39 = arith.cmpf ogt, %33, %15 : vector<16x128xf32>
      %40 = arith.cmpf oeq, %33, %15 : vector<16x128xf32>
      %41 = arith.cmpi slt, %34, %32 : vector<16x128xi32>
      %42 = arith.andi %40, %41 : vector<16x128xi1>
      %43 = arith.ori %39, %42 : vector<16x128xi1>
      %44 = arith.select %43, %33, %15 : vector<16x128xi1>, vector<16x128xf32>
      %45 = arith.select %43, %34, %32 : vector<16x128xi1>, vector<16x128xi32>
      %46 = arith.select %38, %44, %15 : vector<16x128xi1>, vector<16x128xf32>
      %47 = arith.select %38, %45, %32 : vector<16x128xi1>, vector<16x128xi32>
      %c1_i32_22 = arith.constant 1 : i32
      %48 = tpu.dynamic_rotate %15 by %c1_i32_22 dim 1 : vector<16x128xf32>, i32 -> vector<16x128xf32>
      %c1_i32_23 = arith.constant 1 : i32
      %49 = tpu.dynamic_rotate %32 by %c1_i32_23 dim 1 : vector<16x128xi32>, i32 -> vector<16x128xi32>
      %c1_i32_24 = arith.constant 1 : i32
      %50 = vector.broadcast %c1_i32_24 : i32 to vector<16x128xi32>
      %51 = arith.cmpi sge, %32, %50 : vector<16x128xi32>
      %52 = arith.cmpf ogt, %48, %15 : vector<16x128xf32>
      %53 = arith.cmpf oeq, %48, %15 : vector<16x128xf32>
      %54 = arith.cmpi slt, %49, %32 : vector<16x128xi32>
      %55 = arith.andi %53, %54 : vector<16x128xi1>
      %56 = arith.ori %52, %55 : vector<16x128xi1>
      %57 = arith.select %56, %48, %15 : vector<16x128xi1>, vector<16x128xf32>
      %58 = arith.select %56, %49, %32 : vector<16x128xi1>, vector<16x128xi32>
      %59 = arith.select %51, %57, %15 : vector<16x128xi1>, vector<16x128xf32>
      %60 = arith.select %51, %58, %32 : vector<16x128xi1>, vector<16x128xi32>
      %c126_i32 = arith.constant 126 : i32
      %61 = tpu.dynamic_rotate %46 by %c126_i32 dim 1 : vector<16x128xf32>, i32 -> vector<16x128xf32>
      %c126_i32_25 = arith.constant 126 : i32
      %62 = tpu.dynamic_rotate %47 by %c126_i32_25 dim 1 : vector<16x128xi32>, i32 -> vector<16x128xi32>
      %c2_i32 = arith.constant 2 : i32
      %63 = vector.broadcast %c2_i32 : i32 to vector<16x128xi32>
      %64 = arith.addi %32, %63 : vector<16x128xi32>
      %c16_i32_26 = arith.constant 16 : i32
      %65 = vector.broadcast %c16_i32_26 : i32 to vector<16x128xi32>
      %66 = arith.cmpi slt, %64, %65 : vector<16x128xi32>
      %67 = arith.cmpf ogt, %61, %46 : vector<16x128xf32>
      %68 = arith.cmpf oeq, %61, %46 : vector<16x128xf32>
      %69 = arith.cmpi slt, %62, %47 : vector<16x128xi32>
      %70 = arith.andi %68, %69 : vector<16x128xi1>
      %71 = arith.ori %67, %70 : vector<16x128xi1>
      %72 = arith.select %71, %61, %46 : vector<16x128xi1>, vector<16x128xf32>
      %73 = arith.select %71, %62, %47 : vector<16x128xi1>, vector<16x128xi32>
      %74 = arith.select %66, %72, %46 : vector<16x128xi1>, vector<16x128xf32>
      %75 = arith.select %66, %73, %47 : vector<16x128xi1>, vector<16x128xi32>
      %c2_i32_27 = arith.constant 2 : i32
      %76 = tpu.dynamic_rotate %59 by %c2_i32_27 dim 1 : vector<16x128xf32>, i32 -> vector<16x128xf32>
      %c2_i32_28 = arith.constant 2 : i32
      %77 = tpu.dynamic_rotate %60 by %c2_i32_28 dim 1 : vector<16x128xi32>, i32 -> vector<16x128xi32>
      %c2_i32_29 = arith.constant 2 : i32
      %78 = vector.broadcast %c2_i32_29 : i32 to vector<16x128xi32>
      %79 = arith.cmpi sge, %32, %78 : vector<16x128xi32>
      %80 = arith.cmpf ogt, %76, %59 : vector<16x128xf32>
      %81 = arith.cmpf oeq, %76, %59 : vector<16x128xf32>
      %82 = arith.cmpi slt, %77, %60 : vector<16x128xi32>
      %83 = arith.andi %81, %82 : vector<16x128xi1>
      %84 = arith.ori %80, %83 : vector<16x128xi1>
      %85 = arith.select %84, %76, %59 : vector<16x128xi1>, vector<16x128xf32>
      %86 = arith.select %84, %77, %60 : vector<16x128xi1>, vector<16x128xi32>
      %87 = arith.select %79, %85, %59 : vector<16x128xi1>, vector<16x128xf32>
      %88 = arith.select %79, %86, %60 : vector<16x128xi1>, vector<16x128xi32>
      %c124_i32 = arith.constant 124 : i32
      %89 = tpu.dynamic_rotate %74 by %c124_i32 dim 1 : vector<16x128xf32>, i32 -> vector<16x128xf32>
      %c124_i32_30 = arith.constant 124 : i32
      %90 = tpu.dynamic_rotate %75 by %c124_i32_30 dim 1 : vector<16x128xi32>, i32 -> vector<16x128xi32>
      %c4_i32 = arith.constant 4 : i32
      %91 = vector.broadcast %c4_i32 : i32 to vector<16x128xi32>
      %92 = arith.addi %32, %91 : vector<16x128xi32>
      %c16_i32_31 = arith.constant 16 : i32
      %93 = vector.broadcast %c16_i32_31 : i32 to vector<16x128xi32>
      %94 = arith.cmpi slt, %92, %93 : vector<16x128xi32>
      %95 = arith.cmpf ogt, %89, %74 : vector<16x128xf32>
      %96 = arith.cmpf oeq, %89, %74 : vector<16x128xf32>
      %97 = arith.cmpi slt, %90, %75 : vector<16x128xi32>
      %98 = arith.andi %96, %97 : vector<16x128xi1>
      %99 = arith.ori %95, %98 : vector<16x128xi1>
      %100 = arith.select %99, %89, %74 : vector<16x128xi1>, vector<16x128xf32>
      %101 = arith.select %99, %90, %75 : vector<16x128xi1>, vector<16x128xi32>
      %102 = arith.select %94, %100, %74 : vector<16x128xi1>, vector<16x128xf32>
      %103 = arith.select %94, %101, %75 : vector<16x128xi1>, vector<16x128xi32>
      %c4_i32_32 = arith.constant 4 : i32
      %104 = tpu.dynamic_rotate %87 by %c4_i32_32 dim 1 : vector<16x128xf32>, i32 -> vector<16x128xf32>
      %c4_i32_33 = arith.constant 4 : i32
      %105 = tpu.dynamic_rotate %88 by %c4_i32_33 dim 1 : vector<16x128xi32>, i32 -> vector<16x128xi32>
      %c4_i32_34 = arith.constant 4 : i32
      %106 = vector.broadcast %c4_i32_34 : i32 to vector<16x128xi32>
      %107 = arith.cmpi sge, %32, %106 : vector<16x128xi32>
      %108 = arith.cmpf ogt, %104, %87 : vector<16x128xf32>
      %109 = arith.cmpf oeq, %104, %87 : vector<16x128xf32>
      %110 = arith.cmpi slt, %105, %88 : vector<16x128xi32>
      %111 = arith.andi %109, %110 : vector<16x128xi1>
      %112 = arith.ori %108, %111 : vector<16x128xi1>
      %113 = arith.select %112, %104, %87 : vector<16x128xi1>, vector<16x128xf32>
      %114 = arith.select %112, %105, %88 : vector<16x128xi1>, vector<16x128xi32>
      %115 = arith.select %107, %113, %87 : vector<16x128xi1>, vector<16x128xf32>
      %116 = arith.select %107, %114, %88 : vector<16x128xi1>, vector<16x128xi32>
      %c120_i32 = arith.constant 120 : i32
      %117 = tpu.dynamic_rotate %102 by %c120_i32 dim 1 : vector<16x128xf32>, i32 -> vector<16x128xf32>
      %c120_i32_35 = arith.constant 120 : i32
      %118 = tpu.dynamic_rotate %103 by %c120_i32_35 dim 1 : vector<16x128xi32>, i32 -> vector<16x128xi32>
      %c8_i32 = arith.constant 8 : i32
      %119 = vector.broadcast %c8_i32 : i32 to vector<16x128xi32>
      %120 = arith.addi %32, %119 : vector<16x128xi32>
      %c16_i32_36 = arith.constant 16 : i32
      %121 = vector.broadcast %c16_i32_36 : i32 to vector<16x128xi32>
      %122 = arith.cmpi slt, %120, %121 : vector<16x128xi32>
      %123 = arith.cmpf ogt, %117, %102 : vector<16x128xf32>
      %124 = arith.cmpf oeq, %117, %102 : vector<16x128xf32>
      %125 = arith.cmpi slt, %118, %103 : vector<16x128xi32>
      %126 = arith.andi %124, %125 : vector<16x128xi1>
      %127 = arith.ori %123, %126 : vector<16x128xi1>
      %128 = arith.select %127, %117, %102 : vector<16x128xi1>, vector<16x128xf32>
      %129 = arith.select %127, %118, %103 : vector<16x128xi1>, vector<16x128xi32>
      %130 = arith.select %122, %128, %102 : vector<16x128xi1>, vector<16x128xf32>
      %131 = arith.select %122, %129, %103 : vector<16x128xi1>, vector<16x128xi32>
      %c8_i32_37 = arith.constant 8 : i32
      %132 = tpu.dynamic_rotate %115 by %c8_i32_37 dim 1 : vector<16x128xf32>, i32 -> vector<16x128xf32>
      %c8_i32_38 = arith.constant 8 : i32
      %133 = tpu.dynamic_rotate %116 by %c8_i32_38 dim 1 : vector<16x128xi32>, i32 -> vector<16x128xi32>
      %c8_i32_39 = arith.constant 8 : i32
      %134 = vector.broadcast %c8_i32_39 : i32 to vector<16x128xi32>
      %135 = arith.cmpi sge, %32, %134 : vector<16x128xi32>
      %136 = arith.cmpf ogt, %132, %115 : vector<16x128xf32>
      %137 = arith.cmpf oeq, %132, %115 : vector<16x128xf32>
      %138 = arith.cmpi slt, %133, %116 : vector<16x128xi32>
      %139 = arith.andi %137, %138 : vector<16x128xi1>
      %140 = arith.ori %136, %139 : vector<16x128xi1>
      %141 = arith.select %140, %132, %115 : vector<16x128xi1>, vector<16x128xf32>
      %142 = arith.select %140, %133, %116 : vector<16x128xi1>, vector<16x128xi32>
      %143 = arith.select %135, %141, %115 : vector<16x128xi1>, vector<16x128xf32>
      %144 = arith.select %135, %142, %116 : vector<16x128xi1>, vector<16x128xi32>
      %145 = arith.cmpf ogt, %143, %130 : vector<16x128xf32>
      %146 = arith.cmpf oeq, %143, %130 : vector<16x128xf32>
      %147 = arith.cmpi slt, %144, %131 : vector<16x128xi32>
      %148 = arith.andi %146, %147 : vector<16x128xi1>
      %149 = arith.ori %145, %148 : vector<16x128xi1>
      %150 = arith.select %149, %144, %131 : vector<16x128xi1>, vector<16x128xi32>
      %151 = arith.cmpi eq, %32, %150 : vector<16x128xi32>
      %152 = arith.extui %151 : vector<16x128xi1> to vector<16x128xi32>
      %153 = arith.sitofp %152 : vector<16x128xi32> to vector<16x128xf32>
      %c0_40 = arith.constant 0 : index
      %c0_41 = arith.constant 0 : index
      %154 = vector.load %arg8[%c0_40, %c0_41] : memref<16x128xf32, #tpu.memory_space<vmem>>, vector<16x128xf32>
      tpu.vector_store %arg8[%c0_40, %c0_41], %153 {strides = array<i32>} : memref<16x128xf32, #tpu.memory_space<vmem>>, vector<16x128xf32>,
    } else {
    }
    %c0 = arith.constant 0 : index
    %c0_1 = arith.constant 0 : index
    %3 = vector.load %arg8[%c0, %c0_1] : memref<16x128xf32, #tpu.memory_space<vmem>>, vector<16x128xf32>
    %c0_2 = arith.constant 0 : index
    %c0_3 = arith.constant 0 : index
    %4 = vector.load %arg5[%c0_2, %c0_3] : memref<128x128xf32, #tpu.memory_space<vmem>>, vector<128x128xf32>
    %cst = arith.constant dense<0.000000e+00> : vector<16x128xf32>
    %5 = tpu.matmul %3, %4, %cst {dimension_numbers = #tpu.dot_dimension_numbers<[1], [0], [0], [1], [0, 0, 1, 1], [], []>} : vector<16x128xf32>, vector<128x128xf32>, vector<16x128xf32> -> vector<16x128xf32>
    %c0_4 = arith.constant 0 : index
    %c0_5 = arith.constant 0 : index
    %6 = vector.load %arg6[%c0_4, %c0_5] : memref<1x128xf32, #tpu.memory_space<vmem>>, vector<1x128xf32>
    %7 = vector.broadcast %6 : vector<1x128xf32> to vector<16x128xf32>
    %8 = arith.addf %5, %7 : vector<16x128xf32>
    %c0_6 = arith.constant 0 : index
    %c0_7 = arith.constant 0 : index
    %9 = vector.load %arg7[%c0_6, %c0_7] : memref<16x128xf32, #tpu.memory_space<vmem>>, vector<16x128xf32>
    tpu.vector_store %arg7[%c0_6, %c0_7], %8 {strides = array<i32>} : memref<16x128xf32, #tpu.memory_space<vmem>>, vector<16x128xf32>,
    return
  }
  func.func @transform_0(%arg0: i32, %arg1: i32) -> (i32, i32) {
    %c0_i32 = arith.constant 0 : i32
    %c0_i32_0 = arith.constant 0 : i32
    return %arg0, %c0_i32 : i32, i32
  }
  func.func @transform_1(%arg0: i32, %arg1: i32) -> (i32, i32) {
    %c0_i32 = arith.constant 0 : i32
    %c0_i32_0 = arith.constant 0 : i32
    %c0_i32_1 = arith.constant 0 : i32
    return %c0_i32, %c0_i32_0 : i32, i32
  }
  func.func @transform_2(%arg0: i32, %arg1: i32) -> (i32, i32) {
    %c0_i32 = arith.constant 0 : i32
    %c0_i32_0 = arith.constant 0 : i32
    %c0_i32_1 = arith.constant 0 : i32
    return %c0_i32, %c0_i32_0 : i32, i32
  }
  func.func @transform_3(%arg0: i32, %arg1: i32) -> (i32, i32) {
    %c0_i32 = arith.constant 0 : i32
    %c0_i32_0 = arith.constant 0 : i32
    return %c0_i32, %arg1 : i32, i32
  }
  func.func @transform_4(%arg0: i32, %arg1: i32) -> (i32, i32) {
    %c0_i32 = arith.constant 0 : i32
    %c0_i32_0 = arith.constant 0 : i32
    return %c0_i32, %arg1 : i32, i32
  }
  func.func @transform_5(%arg0: i32, %arg1: i32) -> (i32, i32) {
    %c0_i32 = arith.constant 0 : i32
    return %arg0, %arg1 : i32, i32
  }
}

</mosaic_0001>

<bundles_post_ra>
// kernel: pq_linear_forward.1
= control target key start
LH: loop header
LB: loop body
LE: loop exit
PB: predicated region body
PF: predicated region fallthrough
CT: control target
= control target key end

     0   :  { %vm30_vm0 = vcmask 261120   ;;  %v66_v9 = vlaneseq  ;;  %s399_s7 = smov 1   ;;  %s402_s8 = smov 124   ;;  %s763_s1 = inlined_call_operand.vmem [shape: f32[32,128], index: 1, kind: input, shape index: {}]   ;;  %s764_s2 = inlined_call_operand.vmem [shape: f32[1,128], index: 2, kind: input, shape index: {}]   ;;  %s765_s0 = inlined_call_operand.vmem [shape: f32[16,32], index: 0, kind: input, shape index: {}]   ;;  %s766_s4 = inlined_call_operand.vmem [shape: f32[1,128], index: 4, kind: input, shape index: {}]   ;;  %s767_s3 = inlined_call_operand.vmem [shape: f32[128,128], index: 3, kind: input, shape index: {}]   ;;  %s768_s5 = inlined_call_operand.vmem [shape: f32[16,128], index: 5, kind: output, shape index: {}]  }
   0x1   :  { %v29_v0 = vld [vmem:[%s763_s1 + $0x18] sm:$0xff]  ;;  %v28_v1 = vld [vmem:[%s763_s1 + $0x10] sm:$0xff]  ;;  %v27_v2 = vld [vmem:[%s763_s1 + $0x8] sm:$0xff]  ;;  %s403_s9 = smov 4   ;;  %s404_s10 = smov 120  }
   0x2   :  { %49 = vmatpush.msra.mxu0 %v29_v0  ;;  %v26_v3 = vld [vmem:[%s763_s1] sm:$0xff]  ;;  %v25_v5 = vld [vmem:[%s765_s0 + $0x8] sm:$0xff]  ;;  %s398_s1 = smov 127   ;;  %v67_v12 = vand.u32 127, %v66_v9  ;;  %s405_s11 = smov 8  }
   0x3   :  { %v24_v4 = vld [vmem:[%s765_s0] sm:$0xff]  ;;  %s400_s0 = smov 2   ;;  %v317_v44 = vld [vmem:[%s767_s3 + $0x8] sm:$0xff] }
   0x4   :  { %50 = vmatpush.msra.mxu0 %v28_v1  ;;  %v396_v6 = vld [vmem:[%s764_s2] ss:$0 sm:$0xff]  ;;  %v462_v13 = vand.u32 15, %v67_v12  ;;  %s401_s2 = smov 126  }
   0x6   :  { %51 = vmatpush.msra.mxu0 %v27_v2  ;;  %v86_v19 = vadd.s32 1, %v462_v13  ;;  %vm111_vm6 = vcmp.ge.s32.totalorder %v462_v13, 1  ;;  %v137_v41 = vadd.s32 2, %v462_v13 }
   0x8   :  { %52 = vmatpush.msra.mxu0 %v26_v3  ;;  %vm87_vm13 = vcmp.lt.s32.totalorder %v86_v19, 16 }
   0x9   :  { %365 = vmatmul.msk.f32.vlgmr.msra.gmra.mxu0 %vm30_vm0, %v24_v4 }
  0x11   :  { %366 = vmatmul.msk.f32.gmra.mxu0 %vm30_vm0, %v25_v5  ;;  %v192_v5 = vadd.s32 4, %v462_v13 }
  0x86   :  { %v54_v7 = vpop.f32.mrf.mxu0 }
  0x87   :  { %v458_v8 = vsub.f32 %v54_v7, %v396_v6 }
  0x89   :  { %80 = vrot.lane.b32.xlu2 %v458_v8, %s398_s1 }
  0x8e   :  { %v57_v10 = vpop.f32.mrf.mxu0 }
  0x8f   :  { %v65_v11 = vsub.f32 %v57_v10, %v396_v6  ;;  %v406_v10 = vmov 1.0  }
  0x91   :  { %105 = vrot.lane.b32.xlu2 %v458_v8, %s399_s7  ;;  %107 = vrot.lane.b32.xlu1 %v65_v11, %s399_s7 }
  0x92   :  { %82 = vrot.lane.b32.xlu0 %v65_v11, %s398_s1 }
  0x99   :  { %109 = vrot.lane.b32.xlu1 %v462_v13, %s399_s7 }
  0x9a   :  { %84 = vrot.lane.b32.xlu0 %v462_v13, %s398_s1 }
  0xe3   :  { %v81_v18 = vpop.permute.xlu2 %80 }
  0xe4   :  { %vm90_vm7 = vcmp.eq.f32.partialorder %v81_v18, %v458_v8  ;;  %vm88_vm11 = vcmp.gt.f32.partialorder %v81_v18, %v458_v8 }
  0xeb   :  { %v106_v29 = vpop.permute.xlu2 %105 }
 0x103   :  { %v108_v14 = vpop.permute.xlu1 %107 }
 0x104   :  { %v83_v15 = vpop.permute.xlu0 %82  ;;  %vm115_vm2 = vcmp.eq.f32.partialorder %v108_v14, %v65_v11  ;;  %vm113_vm5 = vcmp.gt.f32.partialorder %v108_v14, %v65_v11 }
 0x105   :  { %vm91_vm9 = vcmp.eq.f32.partialorder %v83_v15, %v65_v11  ;;  %vm89_vm14 = vcmp.gt.f32.partialorder %v83_v15, %v65_v11 }
 0x10b   :  { %v110_v16 = vpop.permute.xlu1 %109 }
 0x10c   :  { %vm116_vm1 = vcmp.lt.s32.totalorder %v110_v16, %v462_v13  ;;  %v85_v17 = vpop.permute.xlu0 %84 }
 0x10d   :  { %vm118_vm3 = vmand %vm115_vm2, %vm116_vm1  ;;  %vm92_vm4 = vcmp.lt.s32.totalorder %v85_v17, %v462_v13  ;;  %vm114_vm2 = vcmp.eq.f32.partialorder %v106_v29, %v458_v8 }
 0x10e   :  { %vm473_vm8 = vmor %vm113_vm5, %vm118_vm3 }
 0x10f   :  { %v122_v21 = vsel %vm473_vm8, %v108_v14, %v65_v11  ;;  %vm93_vm10 = vmand %vm90_vm7, %vm92_vm4  ;;  %v124_v32 = vsel %vm473_vm8, %v110_v16, %v462_v13 }
 0x110   :  { %vm94_vm12 = vmand %vm91_vm9, %vm92_vm4  ;;  %v482_v22 = vsel %vm111_vm6, %v122_v21, %v65_v11  ;;  %vm112_vm4 = vcmp.gt.f32.partialorder %v106_v29, %v458_v8  ;;  %v128_v34 = vsel %vm111_vm6, %v124_v32, %v462_v13  ;;  %v329_v32 = vld [vmem:[%s767_s3 + $0x68] sm:$0xff] }
 0x111   :  { %vm95_vm15 = vmor %vm88_vm11, %vm93_vm10  ;;  %159 = vrot.lane.b32.xlu2 %v482_v22, %s400_s0  ;;  %vm138_vm10 = vcmp.lt.s32.totalorder %v137_v41, 16  ;;  %v320_v41 = vld [vmem:[%s767_s3 + $0x20] sm:$0xff] }
 0x112   :  { %vm485_vm0 = vmor %vm89_vm14, %vm94_vm12  ;;  %v97_v24 = vsel %vm95_vm15, %v81_v18, %v458_v8  ;;  %v99_v28 = vsel %vm95_vm15, %v85_v17, %v462_v13 }
 0x113   :  { %v98_v25 = vsel %vm485_vm0, %v83_v15, %v65_v11  ;;  %v101_v26 = vsel %vm87_vm13, %v97_v24, %v458_v8  ;;  %v100_v30 = vsel %vm485_vm0, %v85_v17, %v462_v13  ;;  %v501_v31 = vsel %vm87_vm13, %v99_v28, %v462_v13  ;;  %vm117_vm3 = vmand %vm114_vm2, %vm116_vm1 }
 0x114   :  { %v102_v27 = vsel %vm87_vm13, %v98_v25, %v65_v11  ;;  %129 = vrot.lane.b32.xlu1 %v101_v26, %s401_s2  ;;  %v104_v33 = vsel %vm87_vm13, %v100_v30, %v462_v13  ;;  %vm119_vm5 = vmor %vm112_vm4, %vm117_vm3  ;;  %vm165_vm3 = vcmp.ge.s32.totalorder %v462_v13, 2  ;;  %v331_v30 = vld [vmem:[%s767_s3 + $0x78] sm:$0xff] }
 0x115   :  { %131 = vrot.lane.b32.xlu0 %v102_v27, %s401_s2  ;;  %v123_v35 = vsel %vm119_vm5, %v110_v16, %v462_v13  ;;  %v121_v36 = vsel %vm119_vm5, %v106_v29, %v458_v8  ;;  %371 = vmatpush.msra.mxu2 %v331_v30 }
 0x116   :  { %v127_v37 = vsel %vm111_vm6, %v123_v35, %v462_v13  ;;  %v125_v38 = vsel %vm111_vm6, %v121_v36, %v458_v8  ;;  %336 = vmatpush.msra.mxu1 %v331_v30  ;;  %v326_v35 = vld [vmem:[%s767_s3 + $0x50] sm:$0xff]  ;;  %v325_v36 = vld [vmem:[%s767_s3 + $0x48] sm:$0xff] }
 0x119   :  { %133 = vrot.lane.b32.xlu2 %v501_v31, %s401_s2 }
 0x11c   :  { %135 = vrot.lane.b32.xlu1 %v104_v33, %s401_s2 }
 0x11d   :  { %163 = vrot.lane.b32.xlu0 %v128_v34, %s400_s0 }
 0x124   :  { %161 = vrot.lane.b32.xlu1 %v127_v37, %s400_s0 }
 0x125   :  { %157 = vrot.lane.b32.xlu0 %v125_v38, %s400_s0 }
 0x16b   :  { %v160_v39 = vpop.permute.xlu2 %159 }
 0x16c   :  { %vm169_vm13 = vcmp.eq.f32.partialorder %v160_v39, %v482_v22  ;;  %vm167_vm0 = vcmp.gt.f32.partialorder %v160_v39, %v482_v22 }
 0x173   :  { %v134_v40 = vpop.permute.xlu2 %133 }
 0x174   :  { %vm143_vm1 = vcmp.lt.s32.totalorder %v134_v40, %v501_v31 }
 0x186   :  { %v130_v42 = vpop.permute.xlu1 %129 }
 0x187   :  { %v132_v43 = vpop.permute.xlu0 %131  ;;  %vm139_vm7 = vcmp.gt.f32.partialorder %v130_v42, %v101_v26  ;;  %vm141_vm8 = vcmp.eq.f32.partialorder %v130_v42, %v101_v26 }
 0x188   :  { %vm145_vm9 = vmand %vm141_vm8, %vm143_vm1  ;;  %vm142_vm6 = vcmp.eq.f32.partialorder %v132_v43, %v102_v27  ;;  %vm140_vm4 = vcmp.gt.f32.partialorder %v132_v43, %v102_v27 }
 0x189   :  { %vm526_vm11 = vmor %vm139_vm7, %vm145_vm9 }
 0x18a   :  { %v149_v45 = vsel %vm526_vm11, %v130_v42, %v101_v26  ;;  %v151_v58 = vsel %vm526_vm11, %v134_v40, %v501_v31  ;;  %v321_v40 = vld [vmem:[%s767_s3 + $0x28] sm:$0xff]  ;;  %v319_v42 = vld [vmem:[%s767_s3 + $0x18] sm:$0xff] }
 0x18b   :  { %v533_v46 = vsel %vm138_vm10, %v149_v45, %v101_v26  ;;  %v155_v61 = vsel %vm138_vm10, %v151_v58, %v501_v31  ;;  %v330_v31 = vld [vmem:[%s767_s3 + $0x70] sm:$0xff]  ;;  %v316_v45 = vld [vmem:[%s767_s3] sm:$0xff] }
 0x18c   :  { %184 = vrot.lane.b32.xlu0 %v533_v46, %s402_s8  ;;  %372 = vmatpush.msra.mxu2 %v330_v31 }
 0x18d   :  { %337 = vmatpush.msra.mxu1 %v330_v31 }
 0x18e   :  { %v136_v47 = vpop.permute.xlu1 %135  ;;  %373 = vmatpush.msra.mxu2 %v329_v32 }
 0x18f   :  { %v164_v48 = vpop.permute.xlu0 %163  ;;  %vm144_vm12 = vcmp.lt.s32.totalorder %v136_v47, %v104_v33  ;;  %338 = vmatpush.msra.mxu1 %v329_v32 }
 0x190   :  { %vm171_vm14 = vcmp.lt.s32.totalorder %v164_v48, %v128_v34  ;;  %vm146_vm15 = vmand %vm142_vm6, %vm144_vm12 }
 0x191   :  { %vm173_vm2 = vmand %vm169_vm13, %vm171_vm14 }
 0x192   :  { %vm540_vm5 = vmor %vm167_vm0, %vm173_vm2 }
 0x193   :  { %v177_v50 = vsel %vm540_vm5, %v160_v39, %v482_v22  ;;  %vm148_vm1 = vmor %vm140_vm4, %vm146_vm15  ;;  %v179_v59 = vsel %vm540_vm5, %v164_v48, %v128_v34  ;;  %vm193_vm5 = vcmp.lt.s32.totalorder %v192_v5, 16  ;;  %v322_v39 = vld [vmem:[%s767_s3 + $0x30] sm:$0xff] }
 0x194   :  { %v150_v51 = vsel %vm148_vm1, %v132_v43, %v102_v27  ;;  %v152_v52 = vsel %vm148_vm1, %v136_v47, %v104_v33  ;;  %v181_v53 = vsel %vm165_vm3, %v177_v50, %v482_v22  ;;  %v183_v63 = vsel %vm165_vm3, %v179_v59, %v128_v34  ;;  %v327_v34 = vld [vmem:[%s767_s3 + $0x58] sm:$0xff]  ;;  %v318_v43 = vld [vmem:[%s767_s3 + $0x10] sm:$0xff] }
 0x195   :  { %214 = vrot.lane.b32.xlu1 %v181_v53, %s403_s9  ;;  %v551_v54 = vsel %vm138_vm10, %v152_v52, %v104_v33  ;;  %v154_v55 = vsel %vm138_vm10, %v150_v51, %v102_v27  ;;  %v328_v33 = vld [vmem:[%s767_s3 + $0x60] sm:$0xff]  ;;  %v247_v50 = vadd.s32 8, %v462_v13 }
 0x196   :  { %190 = vrot.lane.b32.xlu0 %v551_v54, %s402_s8  ;;  %186 = vrot.lane.b32.xlu2 %v154_v55, %s402_s8  ;;  %v162_v56 = vpop.permute.xlu1 %161 }
 0x197   :  { %v158_v57 = vpop.permute.xlu0 %157  ;;  %vm170_vm7 = vcmp.lt.s32.totalorder %v162_v56, %v127_v37  ;;  %374 = vmatpush.msra.mxu2 %v328_v33  ;;  %339 = vmatpush.msra.mxu1 %v328_v33 }
 0x198   :  { %vm166_vm8 = vcmp.gt.f32.partialorder %v158_v57, %v125_v38  ;;  %vm168_vm9 = vcmp.eq.f32.partialorder %v158_v57, %v125_v38 }
 0x199   :  { %vm172_vm6 = vmand %vm168_vm9, %vm170_vm7  ;;  %375 = vmatpush.msra.mxu2 %v327_v34  ;;  %340 = vmatpush.msra.mxu1 %v327_v34 }
 0x19a   :  { %vm174_vm12 = vmor %vm166_vm8, %vm172_vm6 }
 0x19b   :  { %v178_v60 = vsel %vm174_vm12, %v162_v56, %v127_v37  ;;  %v176_v0 = vsel %vm174_vm12, %v158_v57, %v125_v38  ;;  %376 = vmatpush.msra.mxu2 %v326_v35  ;;  %341 = vmatpush.msra.mxu1 %v326_v35 }
 0x19c   :  { %v566_v62 = vsel %vm165_vm3, %v178_v60, %v127_v37  ;;  %v180_v1 = vsel %vm165_vm3, %v176_v0, %v125_v38  ;;  %vm220_vm3 = vcmp.ge.s32.totalorder %v462_v13, 4  ;;  %v324_v37 = vld [vmem:[%s767_s3 + $0x40] sm:$0xff]  ;;  %v323_v38 = vld [vmem:[%s767_s3 + $0x38] sm:$0xff] }
 0x19d   :  { %188 = vrot.lane.b32.xlu1 %v155_v61, %s402_s8  ;;  %377 = vmatpush.msra.mxu2 %v325_v36 }
 0x19e   :  { %218 = vrot.lane.b32.xlu2 %v183_v63, %s403_s9  ;;  %216 = vrot.lane.b32.xlu0 %v566_v62, %s403_s9 }
 0x19f   :  { %342 = vmatpush.msra.mxu1 %v325_v36  ;;  %378 = vmatpush.msra.mxu2 %v324_v37 }
 0x1a1   :  { %343 = vmatpush.msra.mxu1 %v324_v37  ;;  %379 = vmatpush.msra.mxu2 %v323_v38 }
 0x1a3   :  { %344 = vmatpush.msra.mxu1 %v323_v38  ;;  %380 = vmatpush.msra.mxu2 %v322_v39 }
 0x1a5   :  { %345 = vmatpush.msra.mxu1 %v322_v39  ;;  %381 = vmatpush.msra.mxu2 %v321_v40 }
 0x1a6   :  { %212 = vrot.lane.b32.xlu2 %v180_v1, %s403_s9 }
 0x1a7   :  { %346 = vmatpush.msra.mxu1 %v321_v40  ;;  %382 = vmatpush.msra.mxu2 %v320_v41 }
 0x1a9   :  { %347 = vmatpush.msra.mxu1 %v320_v41  ;;  %383 = vmatpush.msra.mxu2 %v319_v42 }
 0x1ab   :  { %348 = vmatpush.msra.mxu1 %v319_v42  ;;  %384 = vmatpush.msra.mxu2 %v318_v43 }
 0x1ad   :  { %349 = vmatpush.msra.mxu1 %v318_v43  ;;  %385 = vmatpush.msra.mxu2 %v317_v44 }
 0x1af   :  { %350 = vmatpush.msra.mxu1 %v317_v44  ;;  %386 = vmatpush.msra.mxu2 %v316_v45 }
 0x1b1   :  { %351 = vmatpush.msra.mxu1 %v316_v45 }
 0x1f0   :  { %v187_v2 = vpop.permute.xlu2 %186 }
 0x1f1   :  { %vm197_vm13 = vcmp.eq.f32.partialorder %v187_v2, %v154_v55  ;;  %vm195_vm2 = vcmp.gt.f32.partialorder %v187_v2, %v154_v55 }
 0x1f8   :  { %v219_v4 = vpop.permute.xlu2 %218 }
 0x1f9   :  { %vm226_vm10 = vcmp.lt.s32.totalorder %v219_v4, %v183_v63 }
 0x1fe   :  { %v185_v3 = vpop.permute.xlu0 %184 }
 0x1ff   :  { %vm196_vm8 = vcmp.eq.f32.partialorder %v185_v3, %v533_v46 }
 0x200   :  { %v213_v15 = vpop.permute.xlu2 %212 }
 0x207   :  { %v215_v6 = vpop.permute.xlu1 %214 }
 0x208   :  { %v191_v7 = vpop.permute.xlu0 %190  ;;  %vm224_vm11 = vcmp.eq.f32.partialorder %v215_v6, %v181_v53  ;;  %vm222_vm15 = vcmp.gt.f32.partialorder %v215_v6, %v181_v53 }
 0x209   :  { %vm199_vm14 = vcmp.lt.s32.totalorder %v191_v7, %v551_v54  ;;  %vm228_vm0 = vmand %vm224_vm11, %vm226_vm10  ;;  %vm223_vm10 = vcmp.eq.f32.partialorder %v213_v15, %v180_v1  ;;  %vm194_vm11 = vcmp.gt.f32.partialorder %v185_v3, %v533_v46 }
 0x20a   :  { %vm201_vm4 = vmand %vm197_vm13, %vm199_vm14 }
 0x20b   :  { %vm576_vm1 = vmor %vm195_vm2, %vm201_vm4 }
 0x20c   :  { %v205_v9 = vsel %vm576_vm1, %v187_v2, %v154_v55  ;;  %vm583_vm7 = vmor %vm222_vm15, %vm228_vm0  ;;  %vm221_vm15 = vcmp.gt.f32.partialorder %v213_v15, %v180_v1  ;;  %v207_v25 = vsel %vm576_vm1, %v191_v7, %v551_v54 }
 0x20d   :  { %v232_v11 = vsel %vm583_vm7, %v215_v6, %v181_v53  ;;  %v590_v12 = vsel %vm193_vm5, %v205_v9, %v154_v55  ;;  %v234_v18 = vsel %vm583_vm7, %v219_v4, %v183_v63  ;;  %v634_v27 = vsel %vm193_vm5, %v207_v25, %v551_v54 }
 0x20e   :  { %241 = vrot.lane.b32.xlu1 %v590_v12, %s404_s10  ;;  %v596_v14 = vsel %vm220_vm3, %v232_v11, %v181_v53  ;;  %v608_v21 = vsel %vm220_vm3, %v234_v18, %v183_v63 }
 0x20f   :  { %269 = vrot.lane.b32.xlu0 %v596_v14, %s405_s11  ;;  %v189_v16 = vpop.permute.xlu1 %188 }
 0x210   :  { %v217_v17 = vpop.permute.xlu0 %216  ;;  %vm198_vm9 = vcmp.lt.s32.totalorder %v189_v16, %v155_v61 }
 0x211   :  { %vm225_vm6 = vcmp.lt.s32.totalorder %v217_v17, %v566_v62  ;;  %vm200_vm12 = vmand %vm196_vm8, %vm198_vm9 }
 0x212   :  { %vm227_vm13 = vmand %vm223_vm10, %vm225_vm6  ;;  %vm248_vm10 = vcmp.lt.s32.totalorder %v247_v50, 16 }
 0x213   :  { %vm202_vm14 = vmor %vm194_vm11, %vm200_vm12 }
 0x214   :  { %v204_v19 = vsel %vm202_vm14, %v185_v3, %v533_v46  ;;  %v206_v20 = vsel %vm202_vm14, %v189_v16, %v155_v61  ;;  %vm229_vm0 = vmor %vm221_vm15, %vm227_vm13  ;;  %vm275_vm14 = vcmp.ge.s32.totalorder %v462_v13, 8 }
 0x215   :  { %v613_v22 = vsel %vm193_vm5, %v206_v20, %v155_v61  ;;  %v617_v23 = vsel %vm193_vm5, %v204_v19, %v533_v46  ;;  %v231_v24 = vsel %vm229_vm0, %v213_v15, %v180_v1  ;;  %v233_v28 = vsel %vm229_vm0, %v217_v17, %v566_v62 }
 0x216   :  { %273 = vrot.lane.b32.xlu1 %v608_v21, %s405_s11  ;;  %239 = vrot.lane.b32.xlu2 %v617_v23, %s404_s10  ;;  %v628_v26 = vsel %vm220_vm3, %v231_v24, %v180_v1  ;;  %v642_v29 = vsel %vm220_vm3, %v233_v28, %v566_v62 }
 0x217   :  { %243 = vrot.lane.b32.xlu0 %v613_v22, %s404_s10 }
 0x21e   :  { %267 = vrot.lane.b32.xlu1 %v628_v26, %s405_s11  ;;  %245 = vrot.lane.b32.xlu2 %v634_v27, %s404_s10 }
 0x226   :  { %271 = vrot.lane.b32.xlu2 %v642_v29, %s405_s11 }
 0x270   :  { %v240_v46 = vpop.permute.xlu2 %239 }
 0x271   :  { %vm251_vm9 = vcmp.eq.f32.partialorder %v240_v46, %v617_v23  ;;  %vm249_vm15 = vcmp.gt.f32.partialorder %v240_v46, %v617_v23 }
 0x278   :  { %v246_v49 = vpop.permute.xlu2 %245 }
 0x279   :  { %vm254_vm4 = vcmp.lt.s32.totalorder %v246_v49, %v634_v27 }
 0x280   :  { %v242_v47 = vpop.permute.xlu1 %241  ;;  %v272_v56 = vpop.permute.xlu2 %271 }
 0x281   :  { %v270_v48 = vpop.permute.xlu0 %269  ;;  %vm252_vm2 = vcmp.eq.f32.partialorder %v242_v47, %v590_v12  ;;  %vm250_vm5 = vcmp.gt.f32.partialorder %v242_v47, %v590_v12 }
 0x282   :  { %vm256_vm1 = vmand %vm252_vm2, %vm254_vm4  ;;  %vm279_vm3 = vcmp.eq.f32.partialorder %v270_v48, %v596_v14  ;;  %vm277_vm13 = vcmp.gt.f32.partialorder %v270_v48, %v596_v14  ;;  %vm280_vm4 = vcmp.lt.s32.totalorder %v272_v56, %v642_v29 }
 0x283   :  { %vm699_vm7 = vmor %vm250_vm5, %vm256_vm1 }
 0x284   :  { %v260_v54 = vsel %vm699_vm7, %v242_v47, %v590_v12  ;;  %v262_v55 = vsel %vm699_vm7, %v246_v49, %v634_v27 }
 0x285   :  { %v264_v60 = vsel %vm248_vm10, %v260_v54, %v590_v12  ;;  %v266_v61 = vsel %vm248_vm10, %v262_v55, %v634_v27  ;;  %v397_v12 = vld [vmem:[%s766_s4] ss:$0 sm:$0xff] }
 0x288   :  { %v274_v51 = vpop.permute.xlu1 %273 }
 0x289   :  { %v244_v53 = vpop.permute.xlu0 %243  ;;  %vm281_vm8 = vcmp.lt.s32.totalorder %v274_v51, %v608_v21 }
 0x28a   :  { %vm253_vm6 = vcmp.lt.s32.totalorder %v244_v53, %v613_v22  ;;  %vm283_vm12 = vmand %vm279_vm3, %vm281_vm8 }
 0x28b   :  { %vm255_vm11 = vmand %vm251_vm9, %vm253_vm6 }
 0x28c   :  { %vm285_vm0 = vmor %vm277_vm13, %vm283_vm12 }
 0x28d   :  { %vm715_vm2 = vmor %vm249_vm15, %vm255_vm11  ;;  %v287_v58 = vsel %vm285_vm0, %v270_v48, %v596_v14  ;;  %v289_v59 = vsel %vm285_vm0, %v274_v51, %v608_v21 }
 0x28e   :  { %v293_v62 = vsel %vm275_vm14, %v289_v59, %v608_v21  ;;  %v291_v63 = vsel %vm275_vm14, %v287_v58, %v596_v14  ;;  %v261_v1 = vsel %vm715_vm2, %v244_v53, %v613_v22  ;;  %v259_v2 = vsel %vm715_vm2, %v240_v46, %v617_v23 }
 0x28f   :  { %vm299_vm5 = vcmp.lt.s32.totalorder %v293_v62, %v266_v61  ;;  %vm297_vm1 = vcmp.eq.f32.partialorder %v291_v63, %v264_v60  ;;  %vm295_vm8 = vcmp.gt.f32.partialorder %v291_v63, %v264_v60  ;;  %v265_v3 = vsel %vm248_vm10, %v261_v1, %v613_v22 }
 0x290   :  { %v268_v0 = vpop.permute.xlu1 %267  ;;  %vm301_vm9 = vmand %vm297_vm1, %vm299_vm5  ;;  %v263_v6 = vsel %vm248_vm10, %v259_v2, %v617_v23 }
 0x291   :  { %vm276_vm3 = vcmp.gt.f32.partialorder %v268_v0, %v628_v26  ;;  %vm278_vm7 = vcmp.eq.f32.partialorder %v268_v0, %v628_v26  ;;  %vm303_vm11 = vmor %vm295_vm8, %vm301_vm9 }
 0x292   :  { %vm282_vm6 = vmand %vm278_vm7, %vm280_vm4  ;;  %v305_v8 = vsel %vm303_vm11, %v293_v62, %v266_v61 }
 0x293   :  { %vm284_vm12 = vmor %vm276_vm3, %vm282_vm6  ;;  %vm307_vm0 = vcmp.eq.s32.totalorder %v462_v13, %v305_v8 }
 0x294   :  { %v286_v4 = vsel %vm284_vm12, %v268_v0, %v628_v26  ;;  %v288_v5 = vsel %vm284_vm12, %v272_v56, %v642_v29  ;;  %370 = vmatmul.msk.f32.vlgmr.msra.gmra.mxu2 %vm307_vm0, %v406_v10 }
 0x295   :  { %v290_v7 = vsel %vm275_vm14, %v286_v4, %v628_v26  ;;  %v292_v9 = vsel %vm275_vm14, %v288_v5, %v642_v29 }
 0x296   :  { %vm294_vm13 = vcmp.gt.f32.partialorder %v290_v7, %v263_v6  ;;  %vm296_vm15 = vcmp.eq.f32.partialorder %v290_v7, %v263_v6  ;;  %vm298_vm2 = vcmp.lt.s32.totalorder %v292_v9, %v265_v3 }
 0x297   :  { %vm300_vm4 = vmand %vm296_vm15, %vm298_vm2 }
 0x298   :  { %vm302_vm5 = vmor %vm294_vm13, %vm300_vm4 }
 0x299   :  { %v304_v11 = vsel %vm302_vm5, %v292_v9, %v265_v3 }
 0x29a   :  { %vm306_vm10 = vcmp.eq.s32.totalorder %v462_v13, %v304_v11 }
 0x29b   :  { %369 = vmatmul.msk.f32.vlgmr.msra.gmra.mxu1 %vm306_vm10, %v406_v10 }
 0x317   :  { %v356_v16 = vpop.f32.mrf.mxu2 }
 0x318   :  { %v353_v14 = vpop.f32.mrf.mxu1  ;;  %v357_v17 = vadd.f32 %v397_v12, %v356_v16 }
 0x319   :  { %v354_v15 = vadd.f32 %v397_v12, %v353_v14 }
 0x31a   :  { %360 = vst [vmem:[%s768_s5 + $0x8] sm:$0xff] %v357_v17 }
 0x31b   :  { %359 = vst [vmem:[%s768_s5] sm:$0xff] %v354_v15 }

// kernel: pq_linear_forward.1
= control target key start
LH: loop header
LB: loop body
LE: loop exit
PB: predicated region body
PF: predicated region fallthrough
CT: control target
= control target key end

     0   :  { %vm30_vm0 = vcmask 261120   ;;  %v66_v9 = vlaneseq  ;;  %s399_s7 = smov 1   ;;  %s402_s8 = smov 124   ;;  %s763_s1 = inlined_call_operand.vmem [shape: f32[32,128], index: 1, kind: input, shape index: {}]   ;;  %s764_s2 = inlined_call_operand.vmem [shape: f32[1,128], index: 2, kind: input, shape index: {}]   ;;  %s765_s0 = inlined_call_operand.vmem [shape: f32[16,32], index: 0, kind: input, shape index: {}]   ;;  %s766_s4 = inlined_call_operand.vmem [shape: f32[1,128], index: 4, kind: input, shape index: {}]   ;;  %s767_s3 = inlined_call_operand.vmem [shape: f32[128,128], index: 3, kind: input, shape index: {}]   ;;  %s768_s5 = inlined_call_operand.vmem [shape: f32[16,128], index: 5, kind: output, shape index: {}]  }
   0x1   :  { %v29_v0 = vld [vmem:[%s763_s1 + $0x18] sm:$0xff]  ;;  %v28_v1 = vld [vmem:[%s763_s1 + $0x10] sm:$0xff]  ;;  %v27_v2 = vld [vmem:[%s763_s1 + $0x8] sm:$0xff]  ;;  %s403_s9 = smov 4   ;;  %s404_s10 = smov 120  }
   0x2   :  { %49 = vmatpush.msra.mxu0 %v29_v0  ;;  %v26_v3 = vld [vmem:[%s763_s1] sm:$0xff]  ;;  %v25_v5 = vld [vmem:[%s765_s0 + $0x8] sm:$0xff]  ;;  %s398_s1 = smov 127   ;;  %v67_v12 = vand.u32 127, %v66_v9  ;;  %s405_s11 = smov 8  }
   0x3   :  { %v24_v4 = vld [vmem:[%s765_s0] sm:$0xff]  ;;  %s400_s0 = smov 2   ;;  %v317_v44 = vld [vmem:[%s767_s3 + $0x8] sm:$0xff] }
   0x4   :  { %50 = vmatpush.msra.mxu0 %v28_v1  ;;  %v396_v6 = vld [vmem:[%s764_s2] ss:$0 sm:$0xff]  ;;  %v462_v13 = vand.u32 15, %v67_v12  ;;  %s401_s2 = smov 126  }
   0x6   :  { %51 = vmatpush.msra.mxu0 %v27_v2  ;;  %v86_v19 = vadd.s32 1, %v462_v13  ;;  %vm111_vm6 = vcmp.ge.s32.totalorder %v462_v13, 1  ;;  %v137_v41 = vadd.s32 2, %v462_v13 }
   0x8   :  { %52 = vmatpush.msra.mxu0 %v26_v3  ;;  %vm87_vm13 = vcmp.lt.s32.totalorder %v86_v19, 16 }
   0x9   :  { %365 = vmatmul.msk.f32.vlgmr.msra.gmra.mxu0 %vm30_vm0, %v24_v4 }
  0x11   :  { %366 = vmatmul.msk.f32.gmra.mxu0 %vm30_vm0, %v25_v5  ;;  %v192_v5 = vadd.s32 4, %v462_v13 }
  0x86   :  { %v54_v7 = vpop.f32.mrf.mxu0 }
  0x87   :  { %v458_v8 = vsub.f32 %v54_v7, %v396_v6 }
  0x89   :  { %80 = vrot.lane.b32.xlu2 %v458_v8, %s398_s1 }
  0x8e   :  { %v57_v10 = vpop.f32.mrf.mxu0 }
  0x8f   :  { %v65_v11 = vsub.f32 %v57_v10, %v396_v6  ;;  %v406_v10 = vmov 1.0  }
  0x91   :  { %105 = vrot.lane.b32.xlu2 %v458_v8, %s399_s7  ;;  %107 = vrot.lane.b32.xlu1 %v65_v11, %s399_s7 }
  0x92   :  { %82 = vrot.lane.b32.xlu0 %v65_v11, %s398_s1 }
  0x99   :  { %109 = vrot.lane.b32.xlu1 %v462_v13, %s399_s7 }
  0x9a   :  { %84 = vrot.lane.b32.xlu0 %v462_v13, %s398_s1 }
  0xe3   :  { %v81_v18 = vpop.permute.xlu2 %80 }
  0xe4   :  { %vm90_vm7 = vcmp.eq.f32.partialorder %v81_v18, %v458_v8  ;;  %vm88_vm11 = vcmp.gt.f32.partialorder %v81_v18, %v458_v8 }
  0xeb   :  { %v106_v29 = vpop.permute.xlu2 %105 }
 0x103   :  { %v108_v14 = vpop.permute.xlu1 %107 }
 0x104   :  { %v83_v15 = vpop.permute.xlu0 %82  ;;  %vm115_vm2 = vcmp.eq.f32.partialorder %v108_v14, %v65_v11  ;;  %vm113_vm5 = vcmp.gt.f32.partialorder %v108_v14, %v65_v11 }
 0x105   :  { %vm91_vm9 = vcmp.eq.f32.partialorder %v83_v15, %v65_v11  ;;  %vm89_vm14 = vcmp.gt.f32.partialorder %v83_v15, %v65_v11 }
 0x10b   :  { %v110_v16 = vpop.permute.xlu1 %109 }
 0x10c   :  { %vm116_vm1 = vcmp.lt.s32.totalorder %v110_v16, %v462_v13  ;;  %v85_v17 = vpop.permute.xlu0 %84 }
 0x10d   :  { %vm118_vm3 = vmand %vm115_vm2, %vm116_vm1  ;;  %vm92_vm4 = vcmp.lt.s32.totalorder %v85_v17, %v462_v13  ;;  %vm114_vm2 = vcmp.eq.f32.partialorder %v106_v29, %v458_v8 }
 0x10e   :  { %vm473_vm8 = vmor %vm113_vm5, %vm118_vm3 }
 0x10f   :  { %v122_v21 = vsel %vm473_vm8, %v108_v14, %v65_v11  ;;  %vm93_vm10 = vmand %vm90_vm7, %vm92_vm4  ;;  %v124_v32 = vsel %vm473_vm8, %v110_v16, %v462_v13 }
 0x110   :  { %vm94_vm12 = vmand %vm91_vm9, %vm92_vm4  ;;  %v482_v22 = vsel %vm111_vm6, %v122_v21, %v65_v11  ;;  %vm112_vm4 = vcmp.gt.f32.partialorder %v106_v29, %v458_v8  ;;  %v128_v34 = vsel %vm111_vm6, %v124_v32, %v462_v13  ;;  %v329_v32 = vld [vmem:[%s767_s3 + $0x68] sm:$0xff] }
 0x111   :  { %vm95_vm15 = vmor %vm88_vm11, %vm93_vm10  ;;  %159 = vrot.lane.b32.xlu2 %v482_v22, %s400_s0  ;;  %vm138_vm10 = vcmp.lt.s32.totalorder %v137_v41, 16  ;;  %v320_v41 = vld [vmem:[%s767_s3 + $0x20] sm:$0xff] }
 0x112   :  { %vm485_vm0 = vmor %vm89_vm14, %vm94_vm12  ;;  %v97_v24 = vsel %vm95_vm15, %v81_v18, %v458_v8  ;;  %v99_v28 = vsel %vm95_vm15, %v85_v17, %v462_v13 }
 0x113   :  { %v98_v25 = vsel %vm485_vm0, %v83_v15, %v65_v11  ;;  %v101_v26 = vsel %vm87_vm13, %v97_v24, %v458_v8  ;;  %v100_v30 = vsel %vm485_vm0, %v85_v17, %v462_v13  ;;  %v501_v31 = vsel %vm87_vm13, %v99_v28, %v462_v13  ;;  %vm117_vm3 = vmand %vm114_vm2, %vm116_vm1 }
 0x114   :  { %v102_v27 = vsel %vm87_vm13, %v98_v25, %v65_v11  ;;  %129 = vrot.lane.b32.xlu1 %v101_v26, %s401_s2  ;;  %v104_v33 = vsel %vm87_vm13, %v100_v30, %v462_v13  ;;  %vm119_vm5 = vmor %vm112_vm4, %vm117_vm3  ;;  %vm165_vm3 = vcmp.ge.s32.totalorder %v462_v13, 2  ;;  %v331_v30 = vld [vmem:[%s767_s3 + $0x78] sm:$0xff] }
 0x115   :  { %131 = vrot.lane.b32.xlu0 %v102_v27, %s401_s2  ;;  %v123_v35 = vsel %vm119_vm5, %v110_v16, %v462_v13  ;;  %v121_v36 = vsel %vm119_vm5, %v106_v29, %v458_v8  ;;  %371 = vmatpush.msra.mxu2 %v331_v30 }
 0x116   :  { %v127_v37 = vsel %vm111_vm6, %v123_v35, %v462_v13  ;;  %v125_v38 = vsel %vm111_vm6, %v121_v36, %v458_v8  ;;  %336 = vmatpush.msra.mxu1 %v331_v30  ;;  %v326_v35 = vld [vmem:[%s767_s3 + $0x50] sm:$0xff]  ;;  %v325_v36 = vld [vmem:[%s767_s3 + $0x48] sm:$0xff] }
 0x119   :  { %133 = vrot.lane.b32.xlu2 %v501_v31, %s401_s2 }
 0x11c   :  { %135 = vrot.lane.b32.xlu1 %v104_v33, %s401_s2 }
 0x11d   :  { %163 = vrot.lane.b32.xlu0 %v128_v34, %s400_s0 }
 0x124   :  { %161 = vrot.lane.b32.xlu1 %v127_v37, %s400_s0 }
 0x125   :  { %157 = vrot.lane.b32.xlu0 %v125_v38, %s400_s0 }
 0x16b   :  { %v160_v39 = vpop.permute.xlu2 %159 }
 0x16c   :  { %vm169_vm13 = vcmp.eq.f32.partialorder %v160_v39, %v482_v22  ;;  %vm167_vm0 = vcmp.gt.f32.partialorder %v160_v39, %v482_v22 }
 0x173   :  { %v134_v40 = vpop.permute.xlu2 %133 }
 0x174   :  { %vm143_vm1 = vcmp.lt.s32.totalorder %v134_v40, %v501_v31 }
 0x186   :  { %v130_v42 = vpop.permute.xlu1 %129 }
 0x187   :  { %v132_v43 = vpop.permute.xlu0 %131  ;;  %vm139_vm7 = vcmp.gt.f32.partialorder %v130_v42, %v101_v26  ;;  %vm141_vm8 = vcmp.eq.f32.partialorder %v130_v42, %v101_v26 }
 0x188   :  { %vm145_vm9 = vmand %vm141_vm8, %vm143_vm1  ;;  %vm142_vm6 = vcmp.eq.f32.partialorder %v132_v43, %v102_v27  ;;  %vm140_vm4 = vcmp.gt.f32.partialorder %v132_v43, %v102_v27 }
 0x189   :  { %vm526_vm11 = vmor %vm139_vm7, %vm145_vm9 }
 0x18a   :  { %v149_v45 = vsel %vm526_vm11, %v130_v42, %v101_v26  ;;  %v151_v58 = vsel %vm526_vm11, %v134_v40, %v501_v31  ;;  %v321_v40 = vld [vmem:[%s767_s3 + $0x28] sm:$0xff]  ;;  %v319_v42 = vld [vmem:[%s767_s3 + $0x18] sm:$0xff] }
 0x18b   :  { %v533_v46 = vsel %vm138_vm10, %v149_v45, %v101_v26  ;;  %v155_v61 = vsel %vm138_vm10, %v151_v58, %v501_v31  ;;  %v330_v31 = vld [vmem:[%s767_s3 + $0x70] sm:$0xff]  ;;  %v316_v45 = vld [vmem:[%s767_s3] sm:$0xff] }
 0x18c   :  { %184 = vrot.lane.b32.xlu0 %v533_v46, %s402_s8  ;;  %372 = vmatpush.msra.mxu2 %v330_v31 }
 0x18d   :  { %337 = vmatpush.msra.mxu1 %v330_v31 }
 0x18e   :  { %v136_v47 = vpop.permute.xlu1 %135  ;;  %373 = vmatpush.msra.mxu2 %v329_v32 }
 0x18f   :  { %v164_v48 = vpop.permute.xlu0 %163  ;;  %vm144_vm12 = vcmp.lt.s32.totalorder %v136_v47, %v104_v33  ;;  %338 = vmatpush.msra.mxu1 %v329_v32 }
 0x190   :  { %vm171_vm14 = vcmp.lt.s32.totalorder %v164_v48, %v128_v34  ;;  %vm146_vm15 = vmand %vm142_vm6, %vm144_vm12 }
 0x191   :  { %vm173_vm2 = vmand %vm169_vm13, %vm171_vm14 }
 0x192   :  { %vm540_vm5 = vmor %vm167_vm0, %vm173_vm2 }
 0x193   :  { %v177_v50 = vsel %vm540_vm5, %v160_v39, %v482_v22  ;;  %vm148_vm1 = vmor %vm140_vm4, %vm146_vm15  ;;  %v179_v59 = vsel %vm540_vm5, %v164_v48, %v128_v34  ;;  %vm193_vm5 = vcmp.lt.s32.totalorder %v192_v5, 16  ;;  %v322_v39 = vld [vmem:[%s767_s3 + $0x30] sm:$0xff] }
 0x194   :  { %v150_v51 = vsel %vm148_vm1, %v132_v43, %v102_v27  ;;  %v152_v52 = vsel %vm148_vm1, %v136_v47, %v104_v33  ;;  %v181_v53 = vsel %vm165_vm3, %v177_v50, %v482_v22  ;;  %v183_v63 = vsel %vm165_vm3, %v179_v59, %v128_v34  ;;  %v327_v34 = vld [vmem:[%s767_s3 + $0x58] sm:$0xff]  ;;  %v318_v43 = vld [vmem:[%s767_s3 + $0x10] sm:$0xff] }
 0x195   :  { %214 = vrot.lane.b32.xlu1 %v181_v53, %s403_s9  ;;  %v551_v54 = vsel %vm138_vm10, %v152_v52, %v104_v33  ;;  %v154_v55 = vsel %vm138_vm10, %v150_v51, %v102_v27  ;;  %v328_v33 = vld [vmem:[%s767_s3 + $0x60] sm:$0xff]  ;;  %v247_v50 = vadd.s32 8, %v462_v13 }
 0x196   :  { %190 = vrot.lane.b32.xlu0 %v551_v54, %s402_s8  ;;  %186 = vrot.lane.b32.xlu2 %v154_v55, %s402_s8  ;;  %v162_v56 = vpop.permute.xlu1 %161 }
 0x197   :  { %v158_v57 = vpop.permute.xlu0 %157  ;;  %vm170_vm7 = vcmp.lt.s32.totalorder %v162_v56, %v127_v37  ;;  %374 = vmatpush.msra.mxu2 %v328_v33  ;;  %339 = vmatpush.msra.mxu1 %v328_v33 }
 0x198   :  { %vm166_vm8 = vcmp.gt.f32.partialorder %v158_v57, %v125_v38  ;;  %vm168_vm9 = vcmp.eq.f32.partialorder %v158_v57, %v125_v38 }
 0x199   :  { %vm172_vm6 = vmand %vm168_vm9, %vm170_vm7  ;;  %375 = vmatpush.msra.mxu2 %v327_v34  ;;  %340 = vmatpush.msra.mxu1 %v327_v34 }
 0x19a   :  { %vm174_vm12 = vmor %vm166_vm8, %vm172_vm6 }
 0x19b   :  { %v178_v60 = vsel %vm174_vm12, %v162_v56, %v127_v37  ;;  %v176_v0 = vsel %vm174_vm12, %v158_v57, %v125_v38  ;;  %376 = vmatpush.msra.mxu2 %v326_v35  ;;  %341 = vmatpush.msra.mxu1 %v326_v35 }
 0x19c   :  { %v566_v62 = vsel %vm165_vm3, %v178_v60, %v127_v37  ;;  %v180_v1 = vsel %vm165_vm3, %v176_v0, %v125_v38  ;;  %vm220_vm3 = vcmp.ge.s32.totalorder %v462_v13, 4  ;;  %v324_v37 = vld [vmem:[%s767_s3 + $0x40] sm:$0xff]  ;;  %v323_v38 = vld [vmem:[%s767_s3 + $0x38] sm:$0xff] }
 0x19d   :  { %188 = vrot.lane.b32.xlu1 %v155_v61, %s402_s8  ;;  %377 = vmatpush.msra.mxu2 %v325_v36 }
 0x19e   :  { %218 = vrot.lane.b32.xlu2 %v183_v63, %s403_s9  ;;  %216 = vrot.lane.b32.xlu0 %v566_v62, %s403_s9 }
 0x19f   :  { %342 = vmatpush.msra.mxu1 %v325_v36  ;;  %378 = vmatpush.msra.mxu2 %v324_v37 }
 0x1a1   :  { %343 = vmatpush.msra.mxu1 %v324_v37  ;;  %379 = vmatpush.msra.mxu2 %v323_v38 }
 0x1a3   :  { %344 = vmatpush.msra.mxu1 %v323_v38  ;;  %380 = vmatpush.msra.mxu2 %v322_v39 }
 0x1a5   :  { %345 = vmatpush.msra.mxu1 %v322_v39  ;;  %381 = vmatpush.msra.mxu2 %v321_v40 }
 0x1a6   :  { %212 = vrot.lane.b32.xlu2 %v180_v1, %s403_s9 }
 0x1a7   :  { %346 = vmatpush.msra.mxu1 %v321_v40  ;;  %382 = vmatpush.msra.mxu2 %v320_v41 }
 0x1a9   :  { %347 = vmatpush.msra.mxu1 %v320_v41  ;;  %383 = vmatpush.msra.mxu2 %v319_v42 }
 0x1ab   :  { %348 = vmatpush.msra.mxu1 %v319_v42  ;;  %384 = vmatpush.msra.mxu2 %v318_v43 }
 0x1ad   :  { %349 = vmatpush.msra.mxu1 %v318_v43  ;;  %385 = vmatpush.msra.mxu2 %v317_v44 }
 0x1af   :  { %350 = vmatpush.msra.mxu1 %v317_v44  ;;  %386 = vmatpush.msra.mxu2 %v316_v45 }
 0x1b1   :  { %351 = vmatpush.msra.mxu1 %v316_v45 }
 0x1f0   :  { %v187_v2 = vpop.permute.xlu2 %186 }
 0x1f1   :  { %vm197_vm13 = vcmp.eq.f32.partialorder %v187_v2, %v154_v55  ;;  %vm195_vm2 = vcmp.gt.f32.partialorder %v187_v2, %v154_v55 }
 0x1f8   :  { %v219_v4 = vpop.permute.xlu2 %218 }
 0x1f9   :  { %vm226_vm10 = vcmp.lt.s32.totalorder %v219_v4, %v183_v63 }
 0x1fe   :  { %v185_v3 = vpop.permute.xlu0 %184 }
 0x1ff   :  { %vm196_vm8 = vcmp.eq.f32.partialorder %v185_v3, %v533_v46 }
 0x200   :  { %v213_v15 = vpop.permute.xlu2 %212 }
 0x207   :  { %v215_v6 = vpop.permute.xlu1 %214 }
 0x208   :  { %v191_v7 = vpop.permute.xlu0 %190  ;;  %vm224_vm11 = vcmp.eq.f32.partialorder %v215_v6, %v181_v53  ;;  %vm222_vm15 = vcmp.gt.f32.partialorder %v215_v6, %v181_v53 }
 0x209   :  { %vm199_vm14 = vcmp.lt.s32.totalorder %v191_v7, %v551_v54  ;;  %vm228_vm0 = vmand %vm224_vm11, %vm226_vm10  ;;  %vm223_vm10 = vcmp.eq.f32.partialorder %v213_v15, %v180_v1  ;;  %vm194_vm11 = vcmp.gt.f32.partialorder %v185_v3, %v533_v46 }
 0x20a   :  { %vm201_vm4 = vmand %vm197_vm13, %vm199_vm14 }
 0x20b   :  { %vm576_vm1 = vmor %vm195_vm2, %vm201_vm4 }
 0x20c   :  { %v205_v9 = vsel %vm576_vm1, %v187_v2, %v154_v55  ;;  %vm583_vm7 = vmor %vm222_vm15, %vm228_vm0  ;;  %vm221_vm15 = vcmp.gt.f32.partialorder %v213_v15, %v180_v1  ;;  %v207_v25 = vsel %vm576_vm1, %v191_v7, %v551_v54 }
 0x20d   :  { %v232_v11 = vsel %vm583_vm7, %v215_v6, %v181_v53  ;;  %v590_v12 = vsel %vm193_vm5, %v205_v9, %v154_v55  ;;  %v234_v18 = vsel %vm583_vm7, %v219_v4, %v183_v63  ;;  %v634_v27 = vsel %vm193_vm5, %v207_v25, %v551_v54 }
 0x20e   :  { %241 = vrot.lane.b32.xlu1 %v590_v12, %s404_s10  ;;  %v596_v14 = vsel %vm220_vm3, %v232_v11, %v181_v53  ;;  %v608_v21 = vsel %vm220_vm3, %v234_v18, %v183_v63 }
 0x20f   :  { %269 = vrot.lane.b32.xlu0 %v596_v14, %s405_s11  ;;  %v189_v16 = vpop.permute.xlu1 %188 }
 0x210   :  { %v217_v17 = vpop.permute.xlu0 %216  ;;  %vm198_vm9 = vcmp.lt.s32.totalorder %v189_v16, %v155_v61 }
 0x211   :  { %vm225_vm6 = vcmp.lt.s32.totalorder %v217_v17, %v566_v62  ;;  %vm200_vm12 = vmand %vm196_vm8, %vm198_vm9 }
 0x212   :  { %vm227_vm13 = vmand %vm223_vm10, %vm225_vm6  ;;  %vm248_vm10 = vcmp.lt.s32.totalorder %v247_v50, 16 }
 0x213   :  { %vm202_vm14 = vmor %vm194_vm11, %vm200_vm12 }
 0x214   :  { %v204_v19 = vsel %vm202_vm14, %v185_v3, %v533_v46  ;;  %v206_v20 = vsel %vm202_vm14, %v189_v16, %v155_v61  ;;  %vm229_vm0 = vmor %vm221_vm15, %vm227_vm13  ;;  %vm275_vm14 = vcmp.ge.s32.totalorder %v462_v13, 8 }
 0x215   :  { %v613_v22 = vsel %vm193_vm5, %v206_v20, %v155_v61  ;;  %v617_v23 = vsel %vm193_vm5, %v204_v19, %v533_v46  ;;  %v231_v24 = vsel %vm229_vm0, %v213_v15, %v180_v1  ;;  %v233_v28 = vsel %vm229_vm0, %v217_v17, %v566_v62 }
 0x216   :  { %273 = vrot.lane.b32.xlu1 %v608_v21, %s405_s11  ;;  %239 = vrot.lane.b32.xlu2 %v617_v23, %s404_s10  ;;  %v628_v26 = vsel %vm220_vm3, %v231_v24, %v180_v1  ;;  %v642_v29 = vsel %vm220_vm3, %v233_v28, %v566_v62 }
 0x217   :  { %243 = vrot.lane.b32.xlu0 %v613_v22, %s404_s10 }
 0x21e   :  { %267 = vrot.lane.b32.xlu1 %v628_v26, %s405_s11  ;;  %245 = vrot.lane.b32.xlu2 %v634_v27, %s404_s10 }
 0x226   :  { %271 = vrot.lane.b32.xlu2 %v642_v29, %s405_s11 }
 0x270   :  { %v240_v46 = vpop.permute.xlu2 %239 }
 0x271   :  { %vm251_vm9 = vcmp.eq.f32.partialorder %v240_v46, %v617_v23  ;;  %vm249_vm15 = vcmp.gt.f32.partialorder %v240_v46, %v617_v23 }
 0x278   :  { %v246_v49 = vpop.permute.xlu2 %245 }
 0x279   :  { %vm254_vm4 = vcmp.lt.s32.totalorder %v246_v49, %v634_v27 }
 0x280   :  { %v242_v47 = vpop.permute.xlu1 %241  ;;  %v272_v56 = vpop.permute.xlu2 %271 }
 0x281   :  { %v270_v48 = vpop.permute.xlu0 %269  ;;  %vm252_vm2 = vcmp.eq.f32.partialorder %v242_v47, %v590_v12  ;;  %vm250_vm5 = vcmp.gt.f32.partialorder %v242_v47, %v590_v12 }
 0x282   :  { %vm256_vm1 = vmand %vm252_vm2, %vm254_vm4  ;;  %vm279_vm3 = vcmp.eq.f32.partialorder %v270_v48, %v596_v14  ;;  %vm277_vm13 = vcmp.gt.f32.partialorder %v270_v48, %v596_v14  ;;  %vm280_vm4 = vcmp.lt.s32.totalorder %v272_v56, %v642_v29 }
 0x283   :  { %vm699_vm7 = vmor %vm250_vm5, %vm256_vm1 }
 0x284   :  { %v260_v54 = vsel %vm699_vm7, %v242_v47, %v590_v12  ;;  %v262_v55 = vsel %vm699_vm7, %v246_v49, %v634_v27 }
 0x285   :  { %v264_v60 = vsel %vm248_vm10, %v260_v54, %v590_v12  ;;  %v266_v61 = vsel %vm248_vm10, %v262_v55, %v634_v27  ;;  %v397_v12 = vld [vmem:[%s766_s4] ss:$0 sm:$0xff] }
 0x288   :  { %v274_v51 = vpop.permute.xlu1 %273 }
 0x289   :  { %v244_v53 = vpop.permute.xlu0 %243  ;;  %vm281_vm8 = vcmp.lt.s32.totalorder %v274_v51, %v608_v21 }
 0x28a   :  { %vm253_vm6 = vcmp.lt.s32.totalorder %v244_v53, %v613_v22  ;;  %vm283_vm12 = vmand %vm279_vm3, %vm281_vm8 }
 0x28b   :  { %vm255_vm11 = vmand %vm251_vm9, %vm253_vm6 }
 0x28c   :  { %vm285_vm0 = vmor %vm277_vm13, %vm283_vm12 }
 0x28d   :  { %vm715_vm2 = vmor %vm249_vm15, %vm255_vm11  ;;  %v287_v58 = vsel %vm285_vm0, %v270_v48, %v596_v14  ;;  %v289_v59 = vsel %vm285_vm0, %v274_v51, %v608_v21 }
 0x28e   :  { %v293_v62 = vsel %vm275_vm14, %v289_v59, %v608_v21  ;;  %v291_v63 = vsel %vm275_vm14, %v287_v58, %v596_v14  ;;  %v261_v1 = vsel %vm715_vm2, %v244_v53, %v613_v22  ;;  %v259_v2 = vsel %vm715_vm2, %v240_v46, %v617_v23 }
 0x28f   :  { %vm299_vm5 = vcmp.lt.s32.totalorder %v293_v62, %v266_v61  ;;  %vm297_vm1 = vcmp.eq.f32.partialorder %v291_v63, %v264_v60  ;;  %vm295_vm8 = vcmp.gt.f32.partialorder %v291_v63, %v264_v60  ;;  %v265_v3 = vsel %vm248_vm10, %v261_v1, %v613_v22 }
 0x290   :  { %v268_v0 = vpop.permute.xlu1 %267  ;;  %vm301_vm9 = vmand %vm297_vm1, %vm299_vm5  ;;  %v263_v6 = vsel %vm248_vm10, %v259_v2, %v617_v23 }
 0x291   :  { %vm276_vm3 = vcmp.gt.f32.partialorder %v268_v0, %v628_v26  ;;  %vm278_vm7 = vcmp.eq.f32.partialorder %v268_v0, %v628_v26  ;;  %vm303_vm11 = vmor %vm295_vm8, %vm301_vm9 }
 0x292   :  { %vm282_vm6 = vmand %vm278_vm7, %vm280_vm4  ;;  %v305_v8 = vsel %vm303_vm11, %v293_v62, %v266_v61 }
 0x293   :  { %vm284_vm12 = vmor %vm276_vm3, %vm282_vm6  ;;  %vm307_vm0 = vcmp.eq.s32.totalorder %v462_v13, %v305_v8 }
 0x294   :  { %v286_v4 = vsel %vm284_vm12, %v268_v0, %v628_v26  ;;  %v288_v5 = vsel %vm284_vm12, %v272_v56, %v642_v29  ;;  %370 = vmatmul.msk.f32.vlgmr.msra.gmra.mxu2 %vm307_vm0, %v406_v10 }
 0x295   :  { %v290_v7 = vsel %vm275_vm14, %v286_v4, %v628_v26  ;;  %v292_v9 = vsel %vm275_vm14, %v288_v5, %v642_v29 }
 0x296   :  { %vm294_vm13 = vcmp.gt.f32.partialorder %v290_v7, %v263_v6  ;;  %vm296_vm15 = vcmp.eq.f32.partialorder %v290_v7, %v263_v6  ;;  %vm298_vm2 = vcmp.lt.s32.totalorder %v292_v9, %v265_v3 }
 0x297   :  { %vm300_vm4 = vmand %vm296_vm15, %vm298_vm2 }
 0x298   :  { %vm302_vm5 = vmor %vm294_vm13, %vm300_vm4 }
 0x299   :  { %v304_v11 = vsel %vm302_vm5, %v292_v9, %v265_v3 }
 0x29a   :  { %vm306_vm10 = vcmp.eq.s32.totalorder %v462_v13, %v304_v11 }
 0x29b   :  { %369 = vmatmul.msk.f32.vlgmr.msra.gmra.mxu1 %vm306_vm10, %v406_v10 }
 0x317   :  { %v356_v16 = vpop.f32.mrf.mxu2 }
 0x318   :  { %v353_v14 = vpop.f32.mrf.mxu1  ;;  %v357_v17 = vadd.f32 %v397_v12, %v356_v16 }
 0x319   :  { %v354_v15 = vadd.f32 %v397_v12, %v353_v14 }
 0x31a   :  { %360 = vst [vmem:[%s768_s5 + $0x8] sm:$0xff] %v357_v17 }
 0x31b   :  { %359 = vst [vmem:[%s768_s5] sm:$0xff] %v354_v15 }

</bundles_post_ra>
